<compile_context>
chip_gen: v6e
topology: v6e:2x2x1
jax: 0.10.0
libtpu: 0.0.40
codegen_flags: <defaults>
</compile_context>

<pallas_src>
import functools
import numpy as np

import jax
import jax.numpy as jnp
from jax.experimental import pallas as pl
from jax.experimental.pallas import tpu as pltpu

EPS = 1e-15      # DGI loss path (plain JAX, below)
F_PAD = 128      # padded feature width (logical 100)


# ----------------------------------------------------------------------------
# small helpers
# ----------------------------------------------------------------------------
def _round_up(x, m):
  return ((x + m - 1) // m) * m


def _pick_tile(n, cap):
  for t in (cap, 256, 128, 64, 32, 16, 8):
    if t <= n and n % t == 0:
      return t
  return n


def glorot(key, shape):
  a = np.sqrt(6.0 / (shape[0] + shape[1]))
  return np.asarray(jax.random.uniform(key, shape, jnp.float32, -a, a))


def _pad2(w, shape):
  out = np.zeros(shape, np.float32)
  out[:w.shape[0], :w.shape[1]] = w
  return out


def normalized_adj_from_edges(edge_index, n):
  """Symmetric GCN normalization D^-1/2 (A + I) D^-1/2 (numpy, host)."""
  a = np.zeros((n, n), np.float32)
  if edge_index.size:
    a[edge_index[0], edge_index[1]] = 1.0
    a[edge_index[1], edge_index[0]] = 1.0
  a = a + np.eye(n, dtype=np.float32)
  d = a.sum(1)
  dinv = 1.0 / np.sqrt(np.maximum(d, 1e-12))
  return a * dinv[:, None] * dinv[None, :]


# ----------------------------------------------------------------------------
# Kernel A: cell branch — tiled tanh(omics @ W_cell + b)
# ----------------------------------------------------------------------------
def _cell_feat_kernel(x_ref, w_ref, b_ref, o_ref, acc_ref):
  k = pl.program_id(1)

  @pl.when(k == 0)
  def _():
    acc_ref[...] = jnp.zeros_like(acc_ref)

  acc_ref[...] += jnp.dot(x_ref[...], w_ref[...],
                          preferred_element_type=jnp.float32)

  @pl.when(k == pl.num_programs(1) - 1)
  def _():
    o_ref[...] = jnp.tanh(acc_ref[...] + b_ref[...])


# ----------------------------------------------------------------------------
# Kernel B: drug branch — per-drug padded atom-GCN + mean pool + linear + tanh
# ----------------------------------------------------------------------------
def _drug_feat_kernel(x_ref, a_ref, p_ref, w_atom_ref, w_drug_ref, b_ref, o_ref):
  f32, bf16 = jnp.float32, jnp.bfloat16
  x = x_ref[0]                                  # (MA, A_PAD)  bf16
  a = a_ref[0]                                  # (MA, MA)     bf16
  p = p_ref[0]                                  # (MA, 1)      f32  (exact mean)
  xw = jnp.dot(x, w_atom_ref[...], preferred_element_type=f32)
  h = jnp.maximum(jnp.dot(a, xw.astype(bf16), preferred_element_type=f32), 0.0)
  pooled = jnp.sum(h * p, axis=0, keepdims=True)              # (1, F_PAD) f32
  o_ref[0] = jnp.tanh(jnp.dot(pooled.astype(bf16), w_drug_ref[...],
                              preferred_element_type=f32) + b_ref[...])


# ----------------------------------------------------------------------------
# Kernel C: fused graph head (GCN agg + summaries + fc/fd heads + adjacency)
# ----------------------------------------------------------------------------
def _graph_kernel(cell_ref, drug_ref, a_ref, w_enc_ref, w_sum_ref, w_fc_ref,
                  w_fd_ref, b_heads_ref, b_sum_ref,
                  z_ref, summ_ref, adj_ref, xw_ref, *, index, n_nodes):
  f32, bf16 = jnp.float32, jnp.bfloat16
  cf = cell_ref[...]                            # (index, 128)   f32
  df = drug_ref[...]                            # (n_drugs, 128) f32
  w_enc = w_enc_ref[...]                        # (128, H_PAD)   bf16

  # shared projection feature @ W_enc — halves written straight into scratch
  # (no in-kernel concat of the feature matrix).
  xw_ref[:index, :] = jnp.dot(cf.astype(bf16), w_enc, preferred_element_type=f32)
  xw_ref[index:, :] = jnp.dot(df.astype(bf16), w_enc, preferred_element_type=f32)

  # pos + neg GCN aggregation fused into one MXU matmul via stacked [A_pos;A_neg]
  z_both = jnp.maximum(
      jnp.dot(a_ref[...], xw_ref[...].astype(bf16),
              preferred_element_type=f32), 0.0)                # (2N, H_PAD)
  z_ref[...] = z_both
  pos_z = z_both[:n_nodes]
  neg_z = z_both[n_nodes:]

  # attention summaries — VPU multiply + lane reduce instead of 1/128-lane
  # MXU matvecs; softmax with max-subtraction and approx reciprocal.
  wsum = w_sum_ref[...]
  wf = wsum[0:1, :cf.shape[1]]
  wz = wsum[1:2, :pos_z.shape[1]]
  b_sum = b_sum_ref[0]
  mf = jnp.concatenate([jnp.sum(cf * wf, axis=-1, keepdims=True),
                        jnp.sum(df * wf, axis=-1, keepdims=True)], axis=0)

  def attn_summary(z):
    s = jnp.tanh(mf + jnp.sum(z * wz, axis=-1, keepdims=True) + b_sum)
    s = s - jnp.max(s)                          # defensive max-subtraction
    e = jnp.exp(s)
    inv = pl.reciprocal(jnp.sum(e, axis=0, keepdims=True), approx=True)
    return jnp.sum((e * inv) * z, axis=0, keepdims=True)       # (1, H_PAD)

  summ_ref[0:1, :] = attn_summary(pos_z)
  summ_ref[1:2, :] = attn_summary(neg_z)

  # fc/fd heads folded into the adjacency (no (N,10) concat materialization):
  #   sigmoid([z_c,f_c] @ [z_d,f_d]^T) == sigmoid(z_c@z_d^T + f_c@f_d^T)
  cfe = jax.nn.sigmoid(jnp.dot(cf.astype(bf16), w_fc_ref[...],
                               preferred_element_type=f32) + b_heads_ref[0:1, :])
  dfe = jax.nn.sigmoid(jnp.dot(df.astype(bf16), w_fd_ref[...],
                               preferred_element_type=f32) + b_heads_ref[1:2, :])
  dims = (((1,), (1,)), ((), ()))
  logits = jax.lax.dot_general(pos_z[:index].astype(bf16),
                               pos_z[index:].astype(bf16), dims,
                               preferred_element_type=f32)
  logits += jax.lax.dot_general(cfe, dfe, dims, preferred_element_type=f32)
  # TODO(synk): at production sizes pad n_drugs (last dim) to a multiple of 128
  # with zero-padded drug operands so this store is lane-dense (unmasked vst).
  adj_ref[...] = jax.nn.sigmoid(logits)


# ----------------------------------------------------------------------------
# Device forward (jitted): three pallas_calls + cheap XLA slices
# ----------------------------------------------------------------------------
@functools.partial(jax.jit, static_argnames=("index", "hidden"))
def graphcdr_device_forward(drug_x, mut, gexpr, methyl,
                            a_stack, adjb, poolb, atom_slot,
                            params, *, index, hidden):
  f32, bf16 = jnp.float32, jnp.bfloat16
  n_nodes = a_stack.shape[1]
  n_drugs, ma, _ = adjb.shape
  a_pad = params["W_atom"].shape[0]
  d_pad = params["W_cell"].shape[0]
  h_pad = params["W_enc"].shape[1]

  # -------------------------------------------------------------- cell branch
  omics = jnp.concatenate([mut.astype(f32), gexpr.astype(f32),
                           methyl.astype(f32)], axis=1)
  # TODO(synk): at production sizes hoist this concat/pad/cast of the (static)
  # omics matrices into preprocess() so they are not re-copied every call.
  if omics.shape[1] < d_pad:
    omics = jnp.concatenate(
        [omics, jnp.zeros((index, d_pad - omics.shape[1]), f32)], axis=1)
  omics = omics.astype(bf16)
  tk = min(d_pad, 512)
  tm = _pick_tile(index, 256)
  cell_feat = pl.pallas_call(
      _cell_feat_kernel,
      out_shape=jax.ShapeDtypeStruct((index, F_PAD), f32),
      grid=(index // tm, d_pad // tk),
      in_specs=[pl.BlockSpec((tm, tk), lambda m, k: (m, k)),
                pl.BlockSpec((tk, F_PAD), lambda m, k: (k, 0)),
                pl.BlockSpec((1, F_PAD), lambda m, k: (0, 0))],
      out_specs=pl.BlockSpec((tm, F_PAD), lambda m, k: (m, 0)),
      scratch_shapes=[pltpu.VMEM((tm, F_PAD), f32)],
      compiler_params=pltpu.CompilerParams(
          dimension_semantics=("parallel", "arbitrary")),
  )(omics, params["W_cell"], params["b_cell"])

  # -------------------------------------------------------------- drug branch
  n_atoms, a_dim = drug_x.shape
  xz = jnp.concatenate([drug_x.astype(f32), jnp.zeros((1, a_dim), f32)], axis=0)
  x_pad = jnp.take(xz, atom_slot, axis=0)                    # (nd, ma, a_dim)
  if a_dim < a_pad:
    x_pad = jnp.concatenate(
        [x_pad, jnp.zeros((n_drugs, ma, a_pad - a_dim), f32)], axis=-1)
  x_pad = x_pad.astype(bf16)
  drug_feat = pl.pallas_call(
      _drug_feat_kernel,
      out_shape=jax.ShapeDtypeStruct((n_drugs, 1, F_PAD), f32),
      grid=(n_drugs,),
      in_specs=[pl.BlockSpec((1, ma, a_pad), lambda d: (d, 0, 0)),
                pl.BlockSpec((1, ma, ma), lambda d: (d, 0, 0)),
                pl.BlockSpec((1, ma, 1), lambda d: (d, 0, 0)),
                pl.BlockSpec((a_pad, F_PAD), lambda d: (0, 0)),
                pl.BlockSpec((F_PAD, F_PAD), lambda d: (0, 0)),
                pl.BlockSpec((1, F_PAD), lambda d: (0, 0))],
      out_specs=pl.BlockSpec((1, 1, F_PAD), lambda d: (d, 0, 0)),
      compiler_params=pltpu.CompilerParams(dimension_semantics=("parallel",)),
  )(x_pad, adjb, poolb, params["W_atom"], params["W_drug"], params["b_drug"])
  drug_feat = drug_feat.reshape(n_drugs, F_PAD)

  # ----------------------------------------------------------- fused graph head
  # TODO(synk): for graphs with many thousands of nodes, row-tile a_stack / the
  # adjacency with a ("parallel",) grid; a few hundred nodes fit VMEM as one call.
  VMEM_SPEC = pl.BlockSpec(memory_space=pltpu.MemorySpace.VMEM)
  SMEM_SPEC = pl.BlockSpec(memory_space=pltpu.MemorySpace.SMEM)
  kernel = functools.partial(_graph_kernel, index=index, n_nodes=n_nodes)
  z_both, summ, adj = pl.pallas_call(
      kernel,
      out_shape=(jax.ShapeDtypeStruct((2 * n_nodes, h_pad), f32),
                 jax.ShapeDtypeStruct((2, h_pad), f32),
                 jax.ShapeDtypeStruct((index, n_drugs), f32)),
      in_specs=[VMEM_SPEC] * 8 + [SMEM_SPEC],
      out_specs=(VMEM_SPEC, VMEM_SPEC, VMEM_SPEC),
      scratch_shapes=[pltpu.VMEM((n_nodes, h_pad), f32)],
  )(cell_feat, drug_feat, a_stack, params["W_enc"], params["w_sum"],
    params["W_fc"], params["W_fd"], params["b_heads"], params["b_sum"])

  pos_z = z_both[:n_nodes, :hidden]
  neg_z = z_both[n_nodes:, :hidden]
  return pos_z, neg_z, summ[0, :hidden], summ[1, :hidden], adj.reshape(-1)


# ----------------------------------------------------------------------------
# GraphCDR (Pallas)
# ----------------------------------------------------------------------------
class GraphCDRPallas:
  def __init__(self, hidden_channels, index, atom_dim, omics_dims, key):
    self.hidden_channels = hidden_channels
    self.index = index
    H = hidden_channels
    dm, dg, dme = omics_dims
    d_total = dm + dg + dme
    self.h_pad = _round_up(H, 128)
    self.a_pad = _round_up(atom_dim, 128)
    self.d_pad = (_round_up(d_total, 128) if d_total <= 512
                  else _round_up(d_total, 512))
    ks = jax.random.split(key, 10)

    # logical (unpadded, f32) weights — xavier_uniform, zero biases — kept for
    # the pure-JAX f32 reference / debugging.
    self.ref_params = dict(
        W_fc=glorot(ks[1], (100, 10)), W_fd=glorot(ks[2], (100, 10)),
        W_atom=glorot(ks[3], (atom_dim, 64)), W_drug=glorot(ks[4], (64, 100)),
        W_cell=glorot(ks[5], (d_total, 100)), W_enc=glorot(ks[6], (100, H)),
        W_sum_f=glorot(ks[7], (100, 1)), W_sum_z=glorot(ks[8], (H, 1)),
    )
    rp = self.ref_params
    ws = max(F_PAD, self.h_pad)
    w_sum = np.zeros((2, ws), np.float32)
    w_sum[0, :100] = rp["W_sum_f"][:, 0]
    w_sum[1, :H] = rp["W_sum_z"][:, 0]
    bf16, f32 = jnp.bfloat16, jnp.float32
    # padded, pre-cast (bf16) kernel parameters
    self.params = dict(
        W_atom=jnp.asarray(_pad2(rp["W_atom"], (self.a_pad, F_PAD)), bf16),
        W_drug=jnp.asarray(_pad2(rp["W_drug"], (F_PAD, F_PAD)), bf16),
        b_drug=jnp.zeros((1, F_PAD), f32),
        W_cell=jnp.asarray(_pad2(rp["W_cell"], (self.d_pad, F_PAD)), bf16),
        b_cell=jnp.zeros((1, F_PAD), f32),
        W_enc=jnp.asarray(_pad2(rp["W_enc"], (F_PAD, self.h_pad)), bf16),
        w_sum=jnp.asarray(w_sum, f32),
        b_sum=jnp.zeros((1,), f32),
        W_fc=jnp.asarray(_pad2(rp["W_fc"], (F_PAD, 10)), bf16),
        W_fd=jnp.asarray(_pad2(rp["W_fd"], (F_PAD, 10)), bf16),
        b_heads=jnp.zeros((2, 10), f32),
    )
    # DGI bilinear weight (discriminate / loss only; plain JAX)
    self.weight = jnp.asarray(glorot(ks[0], (H, H)))

  # --- static-graph preprocessing (host numpy, once per graph topology)
  def preprocess(self, drug_adj, ibatch, edge):
    assert self.index % 8 == 0, "pad the cell count to a multiple of 8 sublanes"
    ibatch = np.asarray(ibatch)
    drug_adj = np.asarray(drug_adj, np.float32)
    n_atoms = ibatch.shape[0]
    n_drugs = int(ibatch.max()) + 1
    n_nodes = self.index + n_drugs
    edge = np.asarray(edge)
    pos_edge = edge[edge[:, 2] == 1, 0:2].T.astype(np.int64)
    neg_edge = edge[edge[:, 2] == -1, 0:2].T.astype(np.int64)
    a_pos = normalized_adj_from_edges(pos_edge, n_nodes)
    a_neg = normalized_adj_from_edges(neg_edge, n_nodes)
    a_stack = np.concatenate([a_pos, a_neg], axis=0)          # (2N, N)

    counts = np.bincount(ibatch, minlength=n_drugs)
    ma = _round_up(int(counts.max()), 8)
    adjb = np.zeros((n_drugs, ma, ma), np.float32)
    poolb = np.zeros((n_drugs, ma, 1), np.float32)
    atom_slot = np.full((n_drugs, ma), n_atoms, np.int32)     # pad -> zero row
    for d in range(n_drugs):
      idx = np.where(ibatch == d)[0]
      na = len(idx)
      a = drug_adj[np.ix_(idx, idx)] + np.eye(na, dtype=np.float32)
      deg = a.sum(1)
      dinv = 1.0 / np.sqrt(np.maximum(deg, 1e-12))
      adjb[d, :na, :na] = a * dinv[:, None] * dinv[None, :]
      poolb[d, :na, 0] = 1.0 / na
      atom_slot[d, :na] = idx
    return dict(
        a_stack=jnp.asarray(a_stack, jnp.bfloat16),
        adjb=jnp.asarray(adjb, jnp.bfloat16),
        poolb=jnp.asarray(poolb, jnp.float32),
        atom_slot=jnp.asarray(atom_slot),
    )

  def forward(self, drug_feature, drug_adj, ibatch, mutation_data,
              gexpr_data, methylation_data, edge, static=None):
    if static is None:
      # TODO(synk): per-call host adjacency construction — pass `static`
      # (from preprocess) to keep the hot path fully on-device.
      static = self.preprocess(drug_adj, ibatch, edge)
    return graphcdr_device_forward(
        jnp.asarray(drug_feature, jnp.float32),
        jnp.asarray(mutation_data, jnp.float32),
        jnp.asarray(gexpr_data, jnp.float32),
        jnp.asarray(methylation_data, jnp.float32),
        static["a_stack"], static["adjb"], static["poolb"], static["atom_slot"],
        self.params, index=self.index, hidden=self.hidden_channels)

  # --- DGI discriminate / loss (plain JAX; uses EPS like the reference)
  def discriminate(self, z, summary, sigmoid=True):
    value = z @ (self.weight @ summary)
    return jax.nn.sigmoid(value) if sigmoid else value

  def loss(self, pos_z, neg_z, summary):
    pos_loss = -jnp.log(self.discriminate(pos_z, summary) + EPS).mean()
    neg_loss = -jnp.log(1.0 - self.discriminate(neg_z, summary) + EPS).mean()
    return pos_loss + neg_loss


# ----------------------------------------------------------------------------
if __name__ == "__main__":
  key = jax.random.PRNGKey(0)
  k_in, k_par = jax.random.split(key)
  ks = jax.random.split(k_in, 6)

  # small synthetic shapes
  hidden = 32
  n_cells = 8          # == index (multiple of 8)
  n_drugs = 8
  atoms_per_drug = 3
  n_atoms = n_drugs * atoms_per_drug
  atom_dim = 16
  dm, dg, dme = 50, 30, 20          # omics dims, sum == 100 (fc/fd expect 100)

  drug_feature = jax.random.normal(ks[0], (n_atoms, atom_dim), jnp.float32)
  # block-diagonal chain adjacency inside each drug molecule
  drug_adj = np.zeros((n_atoms, n_atoms), np.float32)
  for d in range(n_drugs):
    base = d * atoms_per_drug
    for a in range(atoms_per_drug - 1):
      drug_adj[base + a, base + a + 1] = 1.0
      drug_adj[base + a + 1, base + a] = 1.0
  ibatch = np.repeat(np.arange(n_drugs), atoms_per_drug).astype(np.int32)

  mutation_data = jax.random.normal(ks[1], (n_cells, dm), jnp.float32)
  gexpr_data = jax.random.normal(ks[2], (n_cells, dg), jnp.float32)
  methylation_data = jax.random.normal(ks[3], (n_cells, dme), jnp.float32)

  # full bipartite cell-drug edge list with deterministic +/-1 labels
  edges = []
  for c in range(n_cells):
    for d in range(n_drugs):
      label = 1 if (c + d) % 2 == 0 else -1
      edges.append([c, n_cells + d, label])
  edge = np.asarray(edges, dtype=np.int64)

  model = GraphCDRPallas(hidden, index=n_cells, atom_dim=atom_dim,
                         omics_dims=(dm, dg, dme), key=k_par)

  # static graph preprocessing done once (off the per-call hot path)
  static = model.preprocess(drug_adj, ibatch, edge)

  outs = model.forward(drug_feature, drug_adj, ibatch, mutation_data,
                       gexpr_data, methylation_data, edge, static=static)
  outs = jax.block_until_ready(outs)
  pos_z, neg_z, summary_pos, summary_neg, pos_adj = [np.asarray(o) for o in outs]

  assert pos_z.shape == (n_cells + n_drugs, hidden)
  assert neg_z.shape == (n_cells + n_drugs, hidden)
  assert summary_pos.shape == (hidden,)
  assert summary_neg.shape == (hidden,)
  assert pos_adj.shape == (n_cells * n_drugs,)
  assert np.all(np.isfinite(pos_adj))
  assert np.all(np.isfinite(pos_z)) and np.all(np.isfinite(neg_z))

  # ---- pure numpy f32 reference (unpadded weights) — tolerance check for the
  #      bf16 / approx-reciprocal kernel path.
  rp = model.ref_params
  xf = np.asarray(drug_feature)
  a_d = drug_adj + np.eye(n_atoms, dtype=np.float32)
  dinv = 1.0 / np.sqrt(a_d.sum(1))
  a_d = a_d * dinv[:, None] * dinv[None, :]
  pool = np.zeros((n_drugs, n_atoms), np.float32)
  pool[ibatch, np.arange(n_atoms)] = 1.0
  pool /= pool.sum(1, keepdims=True)
  atom_h = np.maximum(a_d @ (xf @ rp["W_atom"]), 0.0)
  drug_feat_r = np.tanh(pool @ atom_h @ rp["W_drug"])
  omics = np.concatenate([np.asarray(mutation_data), np.asarray(gexpr_data),
                          np.asarray(methylation_data)], axis=1)
  cell_feat_r = np.tanh(omics @ rp["W_cell"])
  feat_r = np.concatenate([cell_feat_r, drug_feat_r], axis=0)
  n_nodes = n_cells + n_drugs
  a_pos = normalized_adj_from_edges(edge[edge[:, 2] == 1, 0:2].T, n_nodes)
  a_neg = normalized_adj_from_edges(edge[edge[:, 2] == -1, 0:2].T, n_nodes)
  xw_r = feat_r @ rp["W_enc"]
  pz_r = np.maximum(a_pos @ xw_r, 0.0)
  nz_r = np.maximum(a_neg @ xw_r, 0.0)

  def summ_r(z):
    s = np.tanh(feat_r @ rp["W_sum_f"] + z @ rp["W_sum_z"])
    e = np.exp(s - s.max())
    w = e / e.sum()
    return (w * z).sum(0)

  sig = lambda x: 1.0 / (1.0 + np.exp(-x))
  cfe_r = sig(feat_r[:n_cells] @ rp["W_fc"])
  dfe_r = sig(feat_r[n_cells:] @ rp["W_fd"])
  adj_r = sig(pz_r[:n_cells] @ pz_r[n_cells:].T + cfe_r @ dfe_r.T).reshape(-1)

  np.testing.assert_allclose(pos_z, pz_r, rtol=2e-2, atol=5e-2)
  np.testing.assert_allclose(neg_z, nz_r, rtol=2e-2, atol=5e-2)
  np.testing.assert_allclose(summary_pos, summ_r(pz_r), rtol=2e-2, atol=5e-2)
  np.testing.assert_allclose(summary_neg, summ_r(nz_r), rtol=2e-2, atol=5e-2)
  np.testing.assert_allclose(pos_adj, adj_r, rtol=2e-2, atol=5e-2)

  # DGI loss path (plain JAX, uses EPS) — sanity check only
  l = jax.block_until_ready(model.loss(outs[0], outs[1], outs[2]))
  assert bool(jnp.isfinite(l))

  print("KERNEL_OK")
</pallas_src>

<mosaic_0001>
module attributes {stable_mosaic.version = 11 : i64} {
  func.func @_cell_feat_kernel(%arg0: i32, %arg1: i32, %arg2: memref<8x128xbf16, #tpu.memory_space<vmem>>, %arg3: memref<128x128xbf16, #tpu.memory_space<vmem>>, %arg4: memref<1x128xf32, #tpu.memory_space<vmem>>, %arg5: memref<8x128xf32, #tpu.memory_space<vmem>>, %arg6: memref<8x128xf32, #tpu.memory_space<vmem>>) attributes {dimension_semantics = [#tpu.dimension_semantics<parallel>, #tpu.dimension_semantics<arbitrary>], iteration_bounds = array<i64: 1, 1>, scalar_prefetch = 0 : i64, scratch_operands = 1 : i64, tpu.core_type = #tpu.core_type<tc>, window_params = [{transform_indices = @transform_0, window_bounds = array<i64: 8, 128>}, {transform_indices = @transform_1, window_bounds = array<i64: 128, 128>}, {pipeline_mode = #tpu.pipeline_mode<synchronous>, transform_indices = @transform_2, window_bounds = array<i64: 1, 128>}, {transform_indices = @transform_3, window_bounds = array<i64: 8, 128>}]} {
    %c0_i32 = arith.constant 0 : i32
    %0 = arith.cmpi eq, %arg1, %c0_i32 : i32
    %1 = arith.extui %0 : i1 to i32
    %c0_i32_0 = arith.constant 0 : i32
    %2 = arith.cmpi ne, %1, %c0_i32_0 : i32
    scf.if %2 {
      %cst_10 = arith.constant 0.000000e+00 : f32
      %12 = vector.broadcast %cst_10 : f32 to vector<8x128xf32>
      %c0_11 = arith.constant 0 : index
      %c0_12 = arith.constant 0 : index
      %13 = vector.load %arg6[%c0_11, %c0_12] : memref<8x128xf32, #tpu.memory_space<vmem>>, vector<8x128xf32>
      tpu.vector_store %arg6[%c0_11, %c0_12], %12 {strides = array<i32>} : memref<8x128xf32, #tpu.memory_space<vmem>>, vector<8x128xf32>,
    } else {
    }
    %c0 = arith.constant 0 : index
    %c0_1 = arith.constant 0 : index
    %3 = vector.load %arg6[%c0, %c0_1] : memref<8x128xf32, #tpu.memory_space<vmem>>, vector<8x128xf32>
    %c0_2 = arith.constant 0 : index
    %c0_3 = arith.constant 0 : index
    %4 = vector.load %arg2[%c0_2, %c0_3] : memref<8x128xbf16, #tpu.memory_space<vmem>>, vector<8x128xbf16>
    %c0_4 = arith.constant 0 : index
    %c0_5 = arith.constant 0 : index
    %5 = vector.load %arg3[%c0_4, %c0_5] : memref<128x128xbf16, #tpu.memory_space<vmem>>, vector<128x128xbf16>
    %cst = arith.constant dense<0.000000e+00> : vector<8x128xf32>
    %6 = tpu.matmul %4, %5, %cst {dimension_numbers = #tpu.dot_dimension_numbers<[1], [0], [0], [1], [0, 0, 1, 1], [], []>} : vector<8x128xbf16>, vector<128x128xbf16>, vector<8x128xf32> -> vector<8x128xf32>
    %7 = arith.addf %3, %6 : vector<8x128xf32>
    %c0_6 = arith.constant 0 : index
    %c0_7 = arith.constant 0 : index
    %8 = vector.load %arg6[%c0_6, %c0_7] : memref<8x128xf32, #tpu.memory_space<vmem>>, vector<8x128xf32>
    tpu.vector_store %arg6[%c0_6, %c0_7], %7 {strides = array<i32>} : memref<8x128xf32, #tpu.memory_space<vmem>>, vector<8x128xf32>,
    %c0_i32_8 = arith.constant 0 : i32
    %9 = arith.cmpi eq, %arg1, %c0_i32_8 : i32
    %10 = arith.extui %9 : i1 to i32
    %c0_i32_9 = arith.constant 0 : i32
    %11 = arith.cmpi ne, %10, %c0_i32_9 : i32
    scf.if %11 {
      %c0_10 = arith.constant 0 : index
      %c0_11 = arith.constant 0 : index
      %12 = vector.load %arg6[%c0_10, %c0_11] : memref<8x128xf32, #tpu.memory_space<vmem>>, vector<8x128xf32>
      %c0_12 = arith.constant 0 : index
      %c0_13 = arith.constant 0 : index
      %13 = vector.load %arg4[%c0_12, %c0_13] : memref<1x128xf32, #tpu.memory_space<vmem>>, vector<1x128xf32>
      %14 = vector.broadcast %13 : vector<1x128xf32> to vector<8x128xf32>
      %15 = arith.addf %12, %14 : vector<8x128xf32>
      %16 = math.tanh %15 : vector<8x128xf32>
      %c0_14 = arith.constant 0 : index
      %c0_15 = arith.constant 0 : index
      %17 = vector.load %arg5[%c0_14, %c0_15] : memref<8x128xf32, #tpu.memory_space<vmem>>, vector<8x128xf32>
      tpu.vector_store %arg5[%c0_14, %c0_15], %16 {strides = array<i32>} : memref<8x128xf32, #tpu.memory_space<vmem>>, vector<8x128xf32>,
    } else {
    }
    return
  }
  func.func @transform_0(%arg0: i32, %arg1: i32) -> (i32, i32) {
    %c0_i32 = arith.constant 0 : i32
    return %arg0, %arg1 : i32, i32
  }
  func.func @transform_1(%arg0: i32, %arg1: i32) -> (i32, i32) {
    %c0_i32 = arith.constant 0 : i32
    %c0_i32_0 = arith.constant 0 : i32
    return %arg1, %c0_i32 : i32, i32
  }
  func.func @transform_2(%arg0: i32, %arg1: i32) -> (i32, i32) {
    %c0_i32 = arith.constant 0 : i32
    %c0_i32_0 = arith.constant 0 : i32
    %c0_i32_1 = arith.constant 0 : i32
    return %c0_i32, %c0_i32_0 : i32, i32
  }
  func.func @transform_3(%arg0: i32, %arg1: i32) -> (i32, i32) {
    %c0_i32 = arith.constant 0 : i32
    %c0_i32_0 = arith.constant 0 : i32
    return %arg0, %c0_i32 : i32, i32
  }
}

module attributes {stable_mosaic.version = 11 : i64} {
  func.func @_drug_feat_kernel(%arg0: i32, %arg1: memref<1x8x128xbf16, #tpu.memory_space<vmem>>, %arg2: memref<1x8x8xbf16, #tpu.memory_space<vmem>>, %arg3: memref<1x8x1xf32, #tpu.memory_space<vmem>>, %arg4: memref<128x128xbf16, #tpu.memory_space<vmem>>, %arg5: memref<128x128xbf16, #tpu.memory_space<vmem>>, %arg6: memref<1x128xf32, #tpu.memory_space<vmem>>, %arg7: memref<1x1x128xf32, #tpu.memory_space<vmem>>) attributes {dimension_semantics = [#tpu.dimension_semantics<parallel>], iteration_bounds = array<i64: 8>, scalar_prefetch = 0 : i64, scratch_operands = 0 : i64, tpu.core_type = #tpu.core_type<tc>, window_params = [{transform_indices = @transform_0, window_bounds = array<i64: 1, 8, 128>}, {transform_indices = @transform_1, window_bounds = array<i64: 1, 8, 8>}, {transform_indices = @transform_2, window_bounds = array<i64: 1, 8, 1>}, {pipeline_mode = #tpu.pipeline_mode<synchronous>, transform_indices = @transform_3, window_bounds = array<i64: 128, 128>}, {pipeline_mode = #tpu.pipeline_mode<synchronous>, transform_indices = @transform_4, window_bounds = array<i64: 128, 128>}, {pipeline_mode = #tpu.pipeline_mode<synchronous>, transform_indices = @transform_5, window_bounds = array<i64: 1, 128>}, {transform_indices = @transform_6, window_bounds = array<i64: 1, 1, 128>}]} {
    %c0 = arith.constant 0 : index
    %c0_0 = arith.constant 0 : index
    %c0_1 = arith.constant 0 : index
    %0 = vector.load %arg1[%c0, %c0_0, %c0_1] : memref<1x8x128xbf16, #tpu.memory_space<vmem>>, vector<1x8x128xbf16>
    %1 = vector.shape_cast %0 : vector<1x8x128xbf16> to vector<8x128xbf16>
    %c0_2 = arith.constant 0 : index
    %c0_3 = arith.constant 0 : index
    %c0_4 = arith.constant 0 : index
    %2 = vector.load %arg2[%c0_2, %c0_3, %c0_4] : memref<1x8x8xbf16, #tpu.memory_space<vmem>>, vector<1x8x8xbf16>
    %3 = vector.shape_cast %2 : vector<1x8x8xbf16> to vector<8x8xbf16>
    %c0_5 = arith.constant 0 : index
    %c0_6 = arith.constant 0 : index
    %c0_7 = arith.constant 0 : index
    %4 = vector.load %arg3[%c0_5, %c0_6, %c0_7] : memref<1x8x1xf32, #tpu.memory_space<vmem>>, vector<1x8x1xf32>
    %5 = vector.shape_cast %4 : vector<1x8x1xf32> to vector<8x1xf32>
    %c0_8 = arith.constant 0 : index
    %c0_9 = arith.constant 0 : index
    %6 = vector.load %arg4[%c0_8, %c0_9] : memref<128x128xbf16, #tpu.memory_space<vmem>>, vector<128x128xbf16>
    %cst = arith.constant dense<0.000000e+00> : vector<8x128xf32>
    %7 = tpu.matmul %1, %6, %cst {dimension_numbers = #tpu.dot_dimension_numbers<[1], [0], [0], [1], [0, 0, 1, 1], [], []>} : vector<8x128xbf16>, vector<128x128xbf16>, vector<8x128xf32> -> vector<8x128xf32>
    %8 = arith.truncf %7 : vector<8x128xf32> to vector<8x128xbf16>
    %cst_10 = arith.constant dense<0.000000e+00> : vector<8x128xf32>
    %9 = tpu.matmul %3, %8, %cst_10 {dimension_numbers = #tpu.dot_dimension_numbers<[1], [0], [0], [1], [0, 0, 1, 1], [], []>} : vector<8x8xbf16>, vector<8x128xbf16>, vector<8x128xf32> -> vector<8x128xf32>
    %cst_11 = arith.constant 0.000000e+00 : f32
    %10 = vector.broadcast %cst_11 : f32 to vector<8x128xf32>
    %11 = arith.maximumf %9, %10 : vector<8x128xf32>
    %12 = vector.broadcast %5 : vector<8x1xf32> to vector<8x128xf32>
    %13 = arith.mulf %11, %12 : vector<8x128xf32>
    %cst_12 = arith.constant dense<0.000000e+00> : vector<128xf32>
    %14 = vector.multi_reduction <add>, %13, %cst_12 [0] : vector<8x128xf32> to vector<128xf32>
    %15 = vector.shape_cast %14 : vector<128xf32> to vector<1x128xf32>
    %16 = arith.truncf %15 : vector<1x128xf32> to vector<1x128xbf16>
    %c0_13 = arith.constant 0 : index
    %c0_14 = arith.constant 0 : index
    %17 = vector.load %arg5[%c0_13, %c0_14] : memref<128x128xbf16, #tpu.memory_space<vmem>>, vector<128x128xbf16>
    %cst_15 = arith.constant dense<0.000000e+00> : vector<1x128xf32>
    %18 = tpu.matmul %16, %17, %cst_15 {dimension_numbers = #tpu.dot_dimension_numbers<[1], [0], [0], [1], [0, 0, 1, 1], [], []>} : vector<1x128xbf16>, vector<128x128xbf16>, vector<1x128xf32> -> vector<1x128xf32>
    %c0_16 = arith.constant 0 : index
    %c0_17 = arith.constant 0 : index
    %19 = vector.load %arg6[%c0_16, %c0_17] : memref<1x128xf32, #tpu.memory_space<vmem>>, vector<1x128xf32>
    %20 = arith.addf %18, %19 : vector<1x128xf32>
    %21 = math.tanh %20 : vector<1x128xf32>
    %c0_18 = arith.constant 0 : index
    %c0_19 = arith.constant 0 : index
    %c0_20 = arith.constant 0 : index
    %22 = vector.load %arg7[%c0_18, %c0_19, %c0_20] : memref<1x1x128xf32, #tpu.memory_space<vmem>>, vector<1x1x128xf32>
    %23 = vector.shape_cast %22 : vector<1x1x128xf32> to vector<1x128xf32>
    %24 = vector.shape_cast %21 : vector<1x128xf32> to vector<1x1x128xf32>
    tpu.vector_store %arg7[%c0_18, %c0_19, %c0_20], %24 {strides = array<i32>} : memref<1x1x128xf32, #tpu.memory_space<vmem>>, vector<1x1x128xf32>,
    return
  }
  func.func @transform_0(%arg0: i32) -> (i32, i32, i32) {
    %c0_i32 = arith.constant 0 : i32
    %c0_i32_0 = arith.constant 0 : i32
    %c0_i32_1 = arith.constant 0 : i32
    return %arg0, %c0_i32, %c0_i32_0 : i32, i32, i32
  }
  func.func @transform_1(%arg0: i32) -> (i32, i32, i32) {
    %c0_i32 = arith.constant 0 : i32
    %c0_i32_0 = arith.constant 0 : i32
    %c0_i32_1 = arith.constant 0 : i32
    return %arg0, %c0_i32, %c0_i32_0 : i32, i32, i32
  }
  func.func @transform_2(%arg0: i32) -> (i32, i32, i32) {
    %c0_i32 = arith.constant 0 : i32
    %c0_i32_0 = arith.constant 0 : i32
    %c0_i32_1 = arith.constant 0 : i32
    return %arg0, %c0_i32, %c0_i32_0 : i32, i32, i32
  }
  func.func @transform_3(%arg0: i32) -> (i32, i32) {
    %c0_i32 = arith.constant 0 : i32
    %c0_i32_0 = arith.constant 0 : i32
    %c0_i32_1 = arith.constant 0 : i32
    return %c0_i32, %c0_i32_0 : i32, i32
  }
  func.func @transform_4(%arg0: i32) -> (i32, i32) {
    %c0_i32 = arith.constant 0 : i32
    %c0_i32_0 = arith.constant 0 : i32
    %c0_i32_1 = arith.constant 0 : i32
    return %c0_i32, %c0_i32_0 : i32, i32
  }
  func.func @transform_5(%arg0: i32) -> (i32, i32) {
    %c0_i32 = arith.constant 0 : i32
    %c0_i32_0 = arith.constant 0 : i32
    %c0_i32_1 = arith.constant 0 : i32
    return %c0_i32, %c0_i32_0 : i32, i32
  }
  func.func @transform_6(%arg0: i32) -> (i32, i32, i32) {
    %c0_i32 = arith.constant 0 : i32
    %c0_i32_0 = arith.constant 0 : i32
    %c0_i32_1 = arith.constant 0 : i32
    return %arg0, %c0_i32, %c0_i32_0 : i32, i32, i32
  }
}

module attributes {stable_mosaic.version = 11 : i64} {
  func.func @_graph_kernel(%arg0: memref<8x128xf32, #tpu.memory_space<vmem>>, %arg1: memref<8x128xf32, #tpu.memory_space<vmem>>, %arg2: memref<32x16xbf16, #tpu.memory_space<vmem>>, %arg3: memref<128x128xbf16, #tpu.memory_space<vmem>>, %arg4: memref<2x128xf32, #tpu.memory_space<vmem>>, %arg5: memref<128x10xbf16, #tpu.memory_space<vmem>>, %arg6: memref<128x10xbf16, #tpu.memory_space<vmem>>, %arg7: memref<2x10xf32, #tpu.memory_space<vmem>>, %arg8: memref<1xf32, #tpu.memory_space<smem>>, %arg9: memref<32x128xf32, #tpu.memory_space<vmem>>, %arg10: memref<2x128xf32, #tpu.memory_space<vmem>>, %arg11: memref<8x8xf32, #tpu.memory_space<vmem>>, %arg12: memref<16x128xf32, #tpu.memory_space<vmem>>) attributes {dimension_semantics = [], scalar_prefetch = 0 : i64, scratch_operands = 1 : i64, tpu.core_type = #tpu.core_type<tc>} {
    %c0 = arith.constant 0 : index
    %c0_0 = arith.constant 0 : index
    %0 = vector.load %arg0[%c0, %c0_0] : memref<8x128xf32, #tpu.memory_space<vmem>>, vector<8x128xf32>
    %c0_1 = arith.constant 0 : index
    %c0_2 = arith.constant 0 : index
    %1 = vector.load %arg1[%c0_1, %c0_2] : memref<8x128xf32, #tpu.memory_space<vmem>>, vector<8x128xf32>
    %c0_3 = arith.constant 0 : index
    %c0_4 = arith.constant 0 : index
    %2 = vector.load %arg3[%c0_3, %c0_4] : memref<128x128xbf16, #tpu.memory_space<vmem>>, vector<128x128xbf16>
    %3 = arith.truncf %0 : vector<8x128xf32> to vector<8x128xbf16>
    %cst = arith.constant dense<0.000000e+00> : vector<8x128xf32>
    %4 = tpu.matmul %3, %2, %cst {dimension_numbers = #tpu.dot_dimension_numbers<[1], [0], [0], [1], [0, 0, 1, 1], [], []>} : vector<8x128xbf16>, vector<128x128xbf16>, vector<8x128xf32> -> vector<8x128xf32>
    %c0_5 = arith.constant 0 : index
    %c0_6 = arith.constant 0 : index
    %5 = vector.load %arg12[%c0_5, %c0_6] : memref<16x128xf32, #tpu.memory_space<vmem>>, vector<8x128xf32>
    tpu.vector_store %arg12[%c0_5, %c0_6], %4 {strides = array<i32>} : memref<16x128xf32, #tpu.memory_space<vmem>>, vector<8x128xf32>,
    %6 = arith.truncf %1 : vector<8x128xf32> to vector<8x128xbf16>
    %cst_7 = arith.constant dense<0.000000e+00> : vector<8x128xf32>
    %7 = tpu.matmul %6, %2, %cst_7 {dimension_numbers = #tpu.dot_dimension_numbers<[1], [0], [0], [1], [0, 0, 1, 1], [], []>} : vector<8x128xbf16>, vector<128x128xbf16>, vector<8x128xf32> -> vector<8x128xf32>
    %c8 = arith.constant 8 : index
    %c0_8 = arith.constant 0 : index
    %8 = vector.load %arg12[%c8, %c0_8] : memref<16x128xf32, #tpu.memory_space<vmem>>, vector<8x128xf32>
    tpu.vector_store %arg12[%c8, %c0_8], %7 {strides = array<i32>} : memref<16x128xf32, #tpu.memory_space<vmem>>, vector<8x128xf32>,
    %c0_9 = arith.constant 0 : index
    %c0_10 = arith.constant 0 : index
    %9 = vector.load %arg2[%c0_9, %c0_10] : memref<32x16xbf16, #tpu.memory_space<vmem>>, vector<32x16xbf16>
    %c0_11 = arith.constant 0 : index
    %c0_12 = arith.constant 0 : index
    %10 = vector.load %arg12[%c0_11, %c0_12] : memref<16x128xf32, #tpu.memory_space<vmem>>, vector<16x128xf32>
    %11 = arith.truncf %10 : vector<16x128xf32> to vector<16x128xbf16>
    %cst_13 = arith.constant dense<0.000000e+00> : vector<32x128xf32>
    %12 = tpu.matmul %9, %11, %cst_13 {dimension_numbers = #tpu.dot_dimension_numbers<[1], [0], [0], [1], [0, 0, 1, 1], [], []>} : vector<32x16xbf16>, vector<16x128xbf16>, vector<32x128xf32> -> vector<32x128xf32>
    %cst_14 = arith.constant 0.000000e+00 : f32
    %13 = vector.broadcast %cst_14 : f32 to vector<32x128xf32>
    %14 = arith.maximumf %12, %13 : vector<32x128xf32>
    %c0_15 = arith.constant 0 : index
    %c0_16 = arith.constant 0 : index
    %15 = vector.load %arg9[%c0_15, %c0_16] : memref<32x128xf32, #tpu.memory_space<vmem>>, vector<32x128xf32>
    tpu.vector_store %arg9[%c0_15, %c0_16], %14 {strides = array<i32>} : memref<32x128xf32, #tpu.memory_space<vmem>>, vector<32x128xf32>,
    %16 = vector.extract_strided_slice %14 {offsets = [0, 0], sizes = [16, 128], strides = [1, 1]} : vector<32x128xf32> to vector<16x128xf32>
    %17 = vector.extract_strided_slice %14 {offsets = [16, 0], sizes = [16, 128], strides = [1, 1]} : vector<32x128xf32> to vector<16x128xf32>
    %c0_17 = arith.constant 0 : index
    %c0_18 = arith.constant 0 : index
    %18 = vector.load %arg4[%c0_17, %c0_18] : memref<2x128xf32, #tpu.memory_space<vmem>>, vector<2x128xf32>
    %19 = vector.extract_strided_slice %18 {offsets = [0, 0], sizes = [1, 128], strides = [1, 1]} : vector<2x128xf32> to vector<1x128xf32>
    %20 = vector.extract_strided_slice %18 {offsets = [1, 0], sizes = [1, 128], strides = [1, 1]} : vector<2x128xf32> to vector<1x128xf32>
    %c0_19 = arith.constant 0 : index
    %21 = memref.load %arg8[%c0_19] : memref<1xf32, #tpu.memory_space<smem>>
    %22 = vector.broadcast %19 : vector<1x128xf32> to vector<8x128xf32>
    %23 = arith.mulf %0, %22 : vector<8x128xf32>
    %cst_20 = arith.constant dense<0.000000e+00> : vector<8xf32>
    %24 = vector.multi_reduction <add>, %23, %cst_20 [1] : vector<8x128xf32> to vector<8xf32>
    %25 = vector.shape_cast %24 : vector<8xf32> to vector<8x1xf32>
    %26 = vector.broadcast %19 : vector<1x128xf32> to vector<8x128xf32>
    %27 = arith.mulf %1, %26 : vector<8x128xf32>
    %cst_21 = arith.constant dense<0.000000e+00> : vector<8xf32>
    %28 = vector.multi_reduction <add>, %27, %cst_21 [1] : vector<8x128xf32> to vector<8xf32>
    %29 = vector.shape_cast %28 : vector<8xf32> to vector<8x1xf32>
    %30 = tpu.concatenate %25, %29 in 0 : vector<8x1xf32>, vector<8x1xf32> -> vector<16x1xf32>
    %31 = vector.broadcast %20 : vector<1x128xf32> to vector<16x128xf32>
    %32 = arith.mulf %16, %31 : vector<16x128xf32>
    %cst_22 = arith.constant dense<0.000000e+00> : vector<16xf32>
    %33 = vector.multi_reduction <add>, %32, %cst_22 [1] : vector<16x128xf32> to vector<16xf32>
    %34 = vector.shape_cast %33 : vector<16xf32> to vector<16x1xf32>
    %35 = arith.addf %30, %34 : vector<16x1xf32>
    %36 = vector.broadcast %21 : f32 to vector<16x1xf32>
    %37 = arith.addf %35, %36 : vector<16x1xf32>
    %38 = math.tanh %37 : vector<16x1xf32>
    %39 = vector.shape_cast %38 : vector<16x1xf32> to vector<1x16x1xf32>
    %cst_23 = arith.constant dense<0xFF800000> : vector<1xf32>
    %40 = vector.multi_reduction <maximumf>, %39, %cst_23 [1, 2] : vector<1x16x1xf32> to vector<1xf32>
    %41 = vector.shape_cast %40 : vector<1xf32> to vector<1x1x1xf32>
    %42 = vector.extract %41[0, 0, 0] : f32 from vector<1x1x1xf32>
    %43 = vector.broadcast %42 : f32 to vector<16x1xf32>
    %44 = arith.subf %38, %43 : vector<16x1xf32>
    %45 = math.exp %44 : vector<16x1xf32>
    %cst_24 = arith.constant dense<0.000000e+00> : vector<1xf32>
    %46 = vector.multi_reduction <add>, %45, %cst_24 [0] : vector<16x1xf32> to vector<1xf32>
    %47 = vector.shape_cast %46 : vector<1xf32> to vector<1x1xf32>
    %48 = tpu.reciprocal %47 {approx = true} : vector<1x1xf32> -> vector<1x1xf32>
    %49 = vector.broadcast %48 : vector<1x1xf32> to vector<16x1xf32>
    %50 = arith.mulf %45, %49 : vector<16x1xf32>
    %51 = vector.broadcast %50 : vector<16x1xf32> to vector<16x128xf32>
    %52 = arith.mulf %51, %16 : vector<16x128xf32>
    %cst_25 = arith.constant dense<0.000000e+00> : vector<128xf32>
    %53 = vector.multi_reduction <add>, %52, %cst_25 [0] : vector<16x128xf32> to vector<128xf32>
    %54 = vector.shape_cast %53 : vector<128xf32> to vector<1x128xf32>
    %c0_26 = arith.constant 0 : index
    %c0_27 = arith.constant 0 : index
    %55 = vector.load %arg10[%c0_26, %c0_27] : memref<2x128xf32, #tpu.memory_space<vmem>>, vector<1x128xf32>
    tpu.vector_store %arg10[%c0_26, %c0_27], %54 {strides = array<i32>} : memref<2x128xf32, #tpu.memory_space<vmem>>, vector<1x128xf32>,
    %56 = vector.broadcast %20 : vector<1x128xf32> to vector<16x128xf32>
    %57 = arith.mulf %17, %56 : vector<16x128xf32>
    %cst_28 = arith.constant dense<0.000000e+00> : vector<16xf32>
    %58 = vector.multi_reduction <add>, %57, %cst_28 [1] : vector<16x128xf32> to vector<16xf32>
    %59 = vector.shape_cast %58 : vector<16xf32> to vector<16x1xf32>
    %60 = arith.addf %30, %59 : vector<16x1xf32>
    %61 = vector.broadcast %21 : f32 to vector<16x1xf32>
    %62 = arith.addf %60, %61 : vector<16x1xf32>
    %63 = math.tanh %62 : vector<16x1xf32>
    %64 = vector.shape_cast %63 : vector<16x1xf32> to vector<1x16x1xf32>
    %cst_29 = arith.constant dense<0xFF800000> : vector<1xf32>
    %65 = vector.multi_reduction <maximumf>, %64, %cst_29 [1, 2] : vector<1x16x1xf32> to vector<1xf32>
    %66 = vector.shape_cast %65 : vector<1xf32> to vector<1x1x1xf32>
    %67 = vector.extract %66[0, 0, 0] : f32 from vector<1x1x1xf32>
    %68 = vector.broadcast %67 : f32 to vector<16x1xf32>
    %69 = arith.subf %63, %68 : vector<16x1xf32>
    %70 = math.exp %69 : vector<16x1xf32>
    %cst_30 = arith.constant dense<0.000000e+00> : vector<1xf32>
    %71 = vector.multi_reduction <add>, %70, %cst_30 [0] : vector<16x1xf32> to vector<1xf32>
    %72 = vector.shape_cast %71 : vector<1xf32> to vector<1x1xf32>
    %73 = tpu.reciprocal %72 {approx = true} : vector<1x1xf32> -> vector<1x1xf32>
    %74 = vector.broadcast %73 : vector<1x1xf32> to vector<16x1xf32>
    %75 = arith.mulf %70, %74 : vector<16x1xf32>
    %76 = vector.broadcast %75 : vector<16x1xf32> to vector<16x128xf32>
    %77 = arith.mulf %76, %17 : vector<16x128xf32>
    %cst_31 = arith.constant dense<0.000000e+00> : vector<128xf32>
    %78 = vector.multi_reduction <add>, %77, %cst_31 [0] : vector<16x128xf32> to vector<128xf32>
    %79 = vector.shape_cast %78 : vector<128xf32> to vector<1x128xf32>
    %c1 = arith.constant 1 : index
    %c0_32 = arith.constant 0 : index
    %80 = vector.load %arg10[%c1, %c0_32] : memref<2x128xf32, #tpu.memory_space<vmem>>, vector<1x128xf32>
    tpu.vector_store %arg10[%c1, %c0_32], %79 {strides = array<i32>} : memref<2x128xf32, #tpu.memory_space<vmem>>, vector<1x128xf32>,
    %81 = arith.truncf %0 : vector<8x128xf32> to vector<8x128xbf16>
    %c0_33 = arith.constant 0 : index
    %c0_34 = arith.constant 0 : index
    %82 = vector.load %arg5[%c0_33, %c0_34] : memref<128x10xbf16, #tpu.memory_space<vmem>>, vector<128x10xbf16>
    %cst_35 = arith.constant dense<0.000000e+00> : vector<8x10xf32>
    %83 = tpu.matmul %81, %82, %cst_35 {dimension_numbers = #tpu.dot_dimension_numbers<[1], [0], [0], [1], [0, 0, 1, 1], [], []>} : vector<8x128xbf16>, vector<128x10xbf16>, vector<8x10xf32> -> vector<8x10xf32>
    %c0_36 = arith.constant 0 : index
    %c0_37 = arith.constant 0 : index
    %84 = vector.load %arg7[%c0_36, %c0_37] : memref<2x10xf32, #tpu.memory_space<vmem>>, vector<1x10xf32>
    %85 = vector.broadcast %84 : vector<1x10xf32> to vector<8x10xf32>
    %86 = arith.addf %83, %85 : vector<8x10xf32>
    %87 = arith.negf %86 : vector<8x10xf32>
    %88 = math.exp %87 : vector<8x10xf32>
    %cst_38 = arith.constant 1.000000e+00 : f32
    %89 = vector.broadcast %cst_38 : f32 to vector<8x10xf32>
    %90 = arith.addf %89, %88 : vector<8x10xf32>
    %91 = arith.divf %89, %90 : vector<8x10xf32>
    %92 = arith.truncf %1 : vector<8x128xf32> to vector<8x128xbf16>
    %c0_39 = arith.constant 0 : index
    %c0_40 = arith.constant 0 : index
    %93 = vector.load %arg6[%c0_39, %c0_40] : memref<128x10xbf16, #tpu.memory_space<vmem>>, vector<128x10xbf16>
    %cst_41 = arith.constant dense<0.000000e+00> : vector<8x10xf32>
    %94 = tpu.matmul %92, %93, %cst_41 {dimension_numbers = #tpu.dot_dimension_numbers<[1], [0], [0], [1], [0, 0, 1, 1], [], []>} : vector<8x128xbf16>, vector<128x10xbf16>, vector<8x10xf32> -> vector<8x10xf32>
    %c1_42 = arith.constant 1 : index
    %c0_43 = arith.constant 0 : index
    %95 = vector.load %arg7[%c1_42, %c0_43] : memref<2x10xf32, #tpu.memory_space<vmem>>, vector<1x10xf32>
    %96 = vector.broadcast %95 : vector<1x10xf32> to vector<8x10xf32>
    %97 = arith.addf %94, %96 : vector<8x10xf32>
    %98 = arith.negf %97 : vector<8x10xf32>
    %99 = math.exp %98 : vector<8x10xf32>
    %cst_44 = arith.constant 1.000000e+00 : f32
    %100 = vector.broadcast %cst_44 : f32 to vector<8x10xf32>
    %101 = arith.addf %100, %99 : vector<8x10xf32>
    %102 = arith.divf %100, %101 : vector<8x10xf32>
    %103 = vector.extract_strided_slice %16 {offsets = [0, 0], sizes = [8, 128], strides = [1, 1]} : vector<16x128xf32> to vector<8x128xf32>
    %104 = arith.truncf %103 : vector<8x128xf32> to vector<8x128xbf16>
    %105 = vector.extract_strided_slice %16 {offsets = [8, 0], sizes = [8, 128], strides = [1, 1]} : vector<16x128xf32> to vector<8x128xf32>
    %106 = arith.truncf %105 : vector<8x128xf32> to vector<8x128xbf16>
    %cst_45 = arith.constant dense<0.000000e+00> : vector<8x8xf32>
    %107 = tpu.matmul %104, %106, %cst_45 {dimension_numbers = #tpu.dot_dimension_numbers<[1], [1], [0], [0], [0, 0, 1, 0], [], []>} : vector<8x128xbf16>, vector<8x128xbf16>, vector<8x8xf32> -> vector<8x8xf32>
    %cst_46 = arith.constant dense<0.000000e+00> : vector<8x8xf32>
    %108 = tpu.matmul %91, %102, %cst_46 {dimension_numbers = #tpu.dot_dimension_numbers<[1], [1], [0], [0], [0, 0, 1, 0], [], []>} : vector<8x10xf32>, vector<8x10xf32>, vector<8x8xf32> -> vector<8x8xf32>
    %109 = arith.addf %107, %108 : vector<8x8xf32>
    %110 = arith.negf %109 : vector<8x8xf32>
    %111 = math.exp %110 : vector<8x8xf32>
    %cst_47 = arith.constant 1.000000e+00 : f32
    %112 = vector.broadcast %cst_47 : f32 to vector<8x8xf32>
    %113 = arith.addf %112, %111 : vector<8x8xf32>
    %114 = arith.divf %112, %113 : vector<8x8xf32>
    %c0_48 = arith.constant 0 : index
    %c0_49 = arith.constant 0 : index
    %115 = vector.load %arg11[%c0_48, %c0_49] : memref<8x8xf32, #tpu.memory_space<vmem>>, vector<8x8xf32>
    tpu.vector_store %arg11[%c0_48, %c0_49], %114 {strides = array<i32>} : memref<8x8xf32, #tpu.memory_space<vmem>>, vector<8x8xf32>,
    return
  }
}

</mosaic_0001>

<bundles_post_ra>
// kernel: graphcdr_device_forward.3
= control target key start
LH: loop header
LB: loop body
LE: loop exit
PB: predicated region body
PF: predicated region fallthrough
CT: control target
= control target key end

     0   :  { %v196_v0 = vmov 0.0   ;;  %vm197_vm0 = vmmov 0   ;;  %s251_s1 = inlined_call_operand.vmem [shape: bf16[128,128], index: 1, kind: input, shape index: {}]   ;;  %s252_s0 = inlined_call_operand.vmem [shape: bf16[8,128], index: 0, kind: input, shape index: {}]   ;;  %s253_s2 = inlined_call_operand.vmem [shape: f32[1,128], index: 2, kind: input, shape index: {}]   ;;  %s254_s3 = inlined_call_operand.vmem [shape: f32[8,128], index: 3, kind: output, shape index: {}]  }
   0x1   :  { %164 = vmatprep.subr.bf16.mxu0 %v196_v0  ;;  %v186_v1 = vld [vmem:[%s251_s1 + $0x38] sm:$0xff]   ;;  %180 = vmatprep.mubr.msk.bf16.mxu0 %vm197_vm0, %v196_v0  ;;  %v187_v2 = vld [vmem:[%s251_s1 + $0x30] sm:$0xff]   ;;  %v188_v3 = vld [vmem:[%s251_s1 + $0x28] sm:$0xff]  }
   0x2   :  { %165 = vmatpush3.bf16.msra.mxu0 %v186_v1  ;;  %v189_v4 = vld [vmem:[%s251_s1 + $0x20] sm:$0xff]   ;;  %v190_v5 = vld [vmem:[%s251_s1 + $0x18] sm:$0xff]   ;;  %v191_v6 = vld [vmem:[%s251_s1 + $0x10] sm:$0xff]  }
   0x3   :  { %166 = vmatprep.subr.bf16.mxu0 %v196_v0  ;;  %v192_v7 = vld [vmem:[%s251_s1 + $0x8] sm:$0xff]   ;;  %v193_v8 = vld [vmem:[%s251_s1] sm:$0xff]  }
   0x4   :  { %v21_v9 = vld [vmem:[%s252_s0] sm:$0xf] }
   0x5   :  { %v154_v10 = vld [vmem:[%s253_s2] ss:$0 sm:$0xff] }
   0x6   :  { %167 = vmatpush3.bf16.msra.mxu0 %v187_v2 }
   0x7   :  { %168 = vmatprep.subr.bf16.mxu0 %v196_v0 }
   0xa   :  { %169 = vmatpush3.bf16.msra.mxu0 %v188_v3 }
   0xb   :  { %170 = vmatprep.subr.bf16.mxu0 %v196_v0 }
   0xe   :  { %171 = vmatpush3.bf16.msra.mxu0 %v189_v4 }
   0xf   :  { %172 = vmatprep.subr.bf16.mxu0 %v196_v0 }
  0x12   :  { %173 = vmatpush3.bf16.msra.mxu0 %v190_v5 }
  0x13   :  { %174 = vmatprep.subr.bf16.mxu0 %v196_v0 }
  0x16   :  { %175 = vmatpush3.bf16.msra.mxu0 %v191_v6 }
  0x17   :  { %176 = vmatprep.subr.bf16.mxu0 %v196_v0 }
  0x1a   :  { %177 = vmatpush3.bf16.msra.mxu0 %v192_v7 }
  0x1b   :  { %178 = vmatprep.subr.bf16.mxu0 %v196_v0 }
  0x1e   :  { %179 = vmatpush3.bf16.msra.mxu0 %v193_v8 }
  0x21   :  { %181 = vmatmul.mubr.bf16.vlgmr.msra.gmra.mxu0 %v21_v9 }
  0xe1   :  { %v120_v11 = vpop.f32.mrf.mxu0 }
  0xe2   :  { %v139_v12 = vadd.f32 %v154_v10, %v120_v11 }
  0xe3   :  { %v182_v13 = vpop.f32.mrf.mxu0 }
  0xe4   :  { %194 = vtanh.f32 %v139_v12 }
  0xe5   :  { %v123_v14 = vpop.f32.mrf.mxu0 }
  0xe7   :  { %v183_v15 = vpop.f32.mrf.mxu0 }
  0xf1   :  { %v195_v16 = vpop.eup %194 }
  0xf2   :  { %141 = vst [vmem:[%s254_s3] sm:$0xff] %v195_v16 }

// kernel: graphcdr_device_forward.4
= control target key start
LH: loop header
LB: loop body
LE: loop exit
PB: predicated region body
PF: predicated region fallthrough
CT: control target
= control target key end

     0   :  { %s797_s21 = smov 0   ;;  %s899_s0 = inlined_call_operand.vmem [shape: bf16[8,8,128], index: 0, kind: input, shape index: {}]   ;;  %s900_s1 = inlined_call_operand.vmem [shape: bf16[8,8,8], index: 1, kind: input, shape index: {}]   ;;  %s901_s2 = inlined_call_operand.vmem [shape: f32[8,8,1], index: 2, kind: input, shape index: {}]   ;;  %s902_s3 = inlined_call_operand.vmem [shape: bf16[128,128], index: 3, kind: input, shape index: {}]   ;;  %s903_s4 = inlined_call_operand.vmem [shape: bf16[128,128], index: 4, kind: input, shape index: {}]   ;;  %s904_s5 = inlined_call_operand.vmem [shape: f32[1,128], index: 5, kind: input, shape index: {}]   ;;  %s905_s6 = inlined_call_operand.vmem [shape: f32[8,1,128], index: 6, kind: output, shape index: {}]  }
   0x1 LB: > { %s628_s22 = sadd.s32 4294967295, %s757_s21   ;;  %p632_p0 = scmp.ge.s32.totalorder %s757_s21, 1  ;;  %s757_s21 = sphi %s797_s21, %s16_s21  }
   0x2   : > { %p229_p1 = scmp.lt.s32.totalorder %s757_s21, 9 }
   0x4   : > { %p230_p2 = pnand %p632_p0, %p229_p1 }
   0x5   : > { %p264_p3 = scmp.lt.s32.totalorder (!%p230_p2), %s628_s22, 7 }
   0x6   : > { %233 = sbr.rel (%p230_p2) target bundleno = 664 (0x298), region = 44 }
   0xb   : > { %v733_v0 = vld [vmem:[%s902_s3 + $0x38] sm:$0xff]   ;;  %v759_v1 = vmov 0.0   ;;  %v734_v2 = vld [vmem:[%s902_s3 + $0x30] sm:$0xff]   ;;  %vm760_vm0 = vmmov 0   ;;  %v735_v3 = vld [vmem:[%s902_s3 + $0x28] sm:$0xff]   ;;  %s907_s22 = smov (!%p264_p3, %s628_s22), 7 }
   0xc   : > { %675 = vmatprep.subr.bf16.mxu0 %v759_v1  ;;  %695 = vmatprep.subr.bf16.mxu1 %v759_v1  ;;  %v736_v4 = vld [vmem:[%s902_s3 + $0x20] sm:$0xff]   ;;  %v737_v5 = vld [vmem:[%s902_s3 + $0x18] sm:$0xff]   ;;  %v738_v6 = vld [vmem:[%s902_s3 + $0x10] sm:$0xff]   ;;  %s633_s13 = sshll.u32 %s907_s22, 2  ;;  %s635_s19 = sshll.u32 %s907_s22, 3  ;;  %v761_v10 = vmov 0  }
   0xd   : > { %676 = vmatpush3.bf16.msra.mxu0 %v733_v0  ;;  %691 = vmatprep.mubr.msk.bf16.mxu0 %vm760_vm0, %v759_v1  ;;  %v739_v7 = vld [vmem:[%s902_s3 + $0x8] sm:$0xff]   ;;  %v740_v8 = vld [vmem:[%s902_s3] sm:$0xff]   ;;  %s267_s18 = scalar_lea.vmem %s899_s0, %s633_s13  ;;  %s275_s24 = scalar_lea.vmem %s901_s2, %s635_s19  ;;  %vm392_vm1 = vcmask 1043456   ;;  %vm388_vm2 = vcmask 64512   ;;  %v741_v18 = vld [vmem:[%s903_s4 + $0x38] sm:$0xff]  }
   0xe   : > { %677 = vmatprep.subr.bf16.mxu0 %v759_v1  ;;  %697 = vmatprep.mubr.msk.bf16.mxu1 %vm760_vm0, %v759_v1  ;;  %v280_v9 = vld [vmem:[%s267_s18] sm:$0xf]  ;;  %s271_s27 = scalar_lea.vmem %s900_s1, %s633_s13  ;;  %v742_v20 = vld [vmem:[%s903_s4 + $0x30] sm:$0xff]   ;;  %v743_v21 = vld [vmem:[%s903_s4 + $0x28] sm:$0xff]   ;;  %s278_s26 = scalar_lea.vmem %s905_s6, %s907_s22 }
   0xf   : > { %732 = vset.pattern.permute.xlu0 %v761_v10  ;;  %v282_v11 = vld [vmem:[%s275_s24] sm:$0xff]  ;;  %v745_v23 = vld [vmem:[%s903_s4 + $0x18] sm:$0xff]   ;;  %v746_v24 = vld [vmem:[%s903_s4 + $0x10] sm:$0xff]  }
  0x10   : > { %439 = vperm.xlu0 %732, %v282_v11   ;;  %v281_v17 = vld [vmem:[%s271_s27] sm:$0xf]  ;;  %v747_v25 = vld [vmem:[%s903_s4 + $0x8] sm:$0xff]  }
  0x11   : > { %678 = vmatpush3.bf16.msra.mxu0 %v734_v2  ;;  %v744_v22 = vld [vmem:[%s903_s4 + $0x20] sm:$0xff]  }
  0x12   : > { %679 = vmatprep.subr.bf16.mxu0 %v759_v1  ;;  %v748_v26 = vld [vmem:[%s903_s4] sm:$0xff]  }
  0x13   : > { %v466_v41 = vld [vmem:[%s904_s5] sm:$0x1] }
  0x15   : > { %680 = vmatpush3.bf16.msra.mxu0 %v735_v3 }
  0x16   : > { %681 = vmatprep.subr.bf16.mxu0 %v759_v1 }
  0x19   : > { %682 = vmatpush3.bf16.msra.mxu0 %v736_v4 }
  0x1a   : > { %683 = vmatprep.subr.bf16.mxu0 %v759_v1 }
  0x1d   : > { %684 = vmatpush3.bf16.msra.mxu0 %v737_v5 }
  0x1e   : > { %685 = vmatprep.subr.bf16.mxu0 %v759_v1 }
  0x21   : > { %686 = vmatpush3.bf16.msra.mxu0 %v738_v6 }
  0x22   : > { %687 = vmatprep.subr.bf16.mxu0 %v759_v1 }
  0x25   : > { %688 = vmatpush3.bf16.msra.mxu0 %v739_v7 }
  0x26   : > { %689 = vmatprep.subr.bf16.mxu0 %v759_v1 }
  0x29   : > { %690 = vmatpush3.bf16.msra.mxu0 %v740_v8 }
  0x2c   : > { %692 = vmatmul.mubr.bf16.vlgmr.msra.gmra.mxu0 %v280_v9 }
  0x8b   : > { %v440_v28 = vpop.permute.xlu0 %439 }
  0xec   : > { %v381_v12 = vpop.f32.mrf.mxu0 }
  0xed   : > { %v387_v13 = vpack.c.bf16 %v381_v12, %v381_v12 }
  0xee   : > { %v693_v14 = vpop.f32.mrf.mxu0 }
  0xef   : > { %v394_v15 = vsel %vm392_vm1, %v387_v13, 0 }
  0xf0   : > { %v384_v16 = vpop.f32.mrf.mxu0  ;;  %696 = vmatpush3.bf16.msra.mxu1 %v394_v15 }
  0xf1   : > { %701 = vmatprep.subr.bf16.mxu1 %v759_v1 }
  0xf2   : > { %v694_v19 = vpop.f32.mrf.mxu0 }
  0xf3   : > { %698 = vmatmul.mubr.msk.bf16.vlgmr.msra.gmra.mxu1 %vm388_vm2, %v281_v17 }
  0xf4   : > { %702 = vmatpush3.bf16.msra.mxu1 %v741_v18  ;;  %717 = vmatprep.mubr.msk.bf16.mxu1 %vm760_vm0, %v759_v1 }
  0xf5   : > { %703 = vmatprep.subr.bf16.mxu1 %v759_v1 }
  0xf8   : > { %704 = vmatpush3.bf16.msra.mxu1 %v742_v20 }
  0xf9   : > { %705 = vmatprep.subr.bf16.mxu1 %v759_v1 }
  0xfc   : > { %706 = vmatpush3.bf16.msra.mxu1 %v743_v21 }
  0xfd   : > { %707 = vmatprep.subr.bf16.mxu1 %v759_v1 }
 0x100   : > { %708 = vmatpush3.bf16.msra.mxu1 %v744_v22 }
 0x101   : > { %709 = vmatprep.subr.bf16.mxu1 %v759_v1 }
 0x104   : > { %710 = vmatpush3.bf16.msra.mxu1 %v745_v23 }
 0x105   : > { %711 = vmatprep.subr.bf16.mxu1 %v759_v1 }
 0x108   : > { %712 = vmatpush3.bf16.msra.mxu1 %v746_v24 }
 0x109   : > { %713 = vmatprep.subr.bf16.mxu1 %v759_v1 }
 0x10c   : > { %714 = vmatpush3.bf16.msra.mxu1 %v747_v25 }
 0x10d   : > { %715 = vmatprep.subr.bf16.mxu1 %v759_v1 }
 0x110   : > { %716 = vmatpush3.bf16.msra.mxu1 %v748_v26 }
 0x1b3   : > { %v430_v27 = vpop.f32.mrf.mxu1 }
 0x1b4   : > { %v436_v29 = vmax.f32 %v430_v27, 0.0 }
 0x1b5   : > { %v699_v30 = vpop.f32.mrf.mxu1 }
 0x1b6   : > { %v442_v31 = vmul.f32 %v440_v28, %v436_v29 }
 0x1b7   : > { %v433_v32 = vpop.f32.mrf.mxu1 }
 0x1b8   : > { %v443_v33 = vrot.slane %v442_v31, 4 }
 0x1b9   : > { %v700_v34 = vpop.f32.mrf.mxu1 }
 0x1ba   : > { %v444_v35 = vadd.f32 %v443_v33, %v442_v31 }
 0x1bc   : > { %v445_v36 = vrot.slane %v444_v35, 2 }
 0x1be   : > { %v446_v37 = vadd.f32 %v445_v36, %v444_v35 }
 0x1c0   : > { %v447_v38 = vrot.slane %v446_v37, 1 }
 0x1c2   : > { %v448_v39 = vadd.f32 %v447_v38, %v446_v37 }
 0x1c4   : > { %v449_v40 = vpack.c.bf16 %v448_v39, %v448_v39 }
 0x1c6   : > { %718 = vmatmul.mubr.bf16.vlgmr.msra.gmra.mxu1 %v449_v40 }
 0x286   : > { %v549_v42 = vpop.f32.mrf.mxu1 }
 0x287   : > { %v550_v43 = vadd.f32 %v549_v42, %v466_v41 }
 0x288   : > { %v719_v44 = vpop.f32.mrf.mxu1 }
 0x289   : > { %749 = vtanh.f32 %v550_v43 }
 0x28a   : > { %v552_v45 = vpop.f32.mrf.mxu1 }
 0x28c   : > { %v720_v46 = vpop.f32.mrf.mxu1 }
 0x296   : > { %v750_v47 = vpop.eup %749 }
 0x297   : > { %556 = vst [vmem:[%s278_s26] sm:$0x1] %v750_v47 }
 0x298 PF: > { %s16_s21 = sadd.s32 1, %s757_s21  }
 0x299   : > { %p13_p4 = scmp.ge.s32.totalorder %s16_s21, 10  }
 0x29b   :  { %15 = sbr.rel (!%p13_p4) target bundleno = 1 (0x1), region = 80 }

// kernel: graphcdr_device_forward.5
= control target key start
LH: loop header
LB: loop body
LE: loop exit
PB: predicated region body
PF: predicated region fallthrough
CT: control target
= control target key end

     0   :  { %v1023_v0 = vmov 0.0   ;;  %vm1024_vm0 = vmmov 0   ;;  %vm204_vm1 = vcmask 130048   ;;  %v270_v40 = vlaneseq  ;;  %s1299_s3 = inlined_call_operand.vmem [shape: bf16[128,128], index: 3, kind: input, shape index: {}]   ;;  %s1300_s0 = inlined_call_operand.vmem [shape: f32[8,128], index: 0, kind: input, shape index: {}]   ;;  %s1301_s1 = inlined_call_operand.vmem [shape: f32[8,128], index: 1, kind: input, shape index: {}]   ;;  %s1302_s6 = inlined_call_operand.vmem [shape: bf16[128,10], index: 6, kind: input, shape index: {}]   ;;  %s1303_s2 = inlined_call_operand.vmem [shape: bf16[32,16], index: 2, kind: input, shape index: {}]   ;;  %s1304_s5 = inlined_call_operand.vmem [shape: bf16[128,10], index: 5, kind: input, shape index: {}]   ;;  %s1305_s4 = inlined_call_operand.vmem [shape: f32[2,128], index: 4, kind: input, shape index: {}]   ;;  %s1306_s7 = inlined_call_operand.vmem [shape: f32[2,10], index: 7, kind: input, shape index: {}]   ;;  %s1307_s9 = inlined_call_operand.vmem [shape: f32[32,128], index: 9, kind: output, shape index: {0}]   ;;  %s1308_s8 = inlined_call_operand.<no memory space> [shape: f32[1], index: 8, kind: input, shape index: {}]   ;;  %s1309_s11 = inlined_call_operand.vmem [shape: f32[8,8], index: 11, kind: output, shape index: {2}]   ;;  %s1310_s10 = inlined_call_operand.vmem [shape: f32[2,128], index: 10, kind: output, shape index: {1}]  }
   0x1   :  { %859 = vmatprep.subr.bf16.mxu0 %v1023_v0  ;;  %879 = vmatprep.subr.bf16.mxu1 %v1023_v0  ;;  %v965_v1 = vld [vmem:[%s1299_s3 + $0x38] sm:$0xff]   ;;  %v966_v2 = vld [vmem:[%s1299_s3 + $0x30] sm:$0xff]   ;;  %v967_v3 = vld [vmem:[%s1299_s3 + $0x28] sm:$0xff]   ;;  %vm644_vm2 = vcmask 80896   ;;  %vm297_vm3 = vcmask 7168   ;;  %vm767_vm4 = vcmask 64512  }
   0x2   :  { %875 = vmatprep.mubr.msk.bf16.mxu0 %vm1024_vm0, %v1023_v0  ;;  %895 = vmatprep.mubr.msk.bf16.mxu1 %vm1024_vm0, %v1023_v0  ;;  %v968_v4 = vld [vmem:[%s1299_s3 + $0x20] sm:$0xff]   ;;  %v969_v5 = vld [vmem:[%s1299_s3 + $0x18] sm:$0xff]   ;;  %v970_v6 = vld [vmem:[%s1299_s3 + $0x10] sm:$0xff]   ;;  %v271_v41 = vshrl.u32 %v270_v40, 7 }
   0x3   :  { %860 = vmatpush3.bf16.msra.mxu0 %v965_v1  ;;  %880 = vmatpush3.bf16.msra.mxu1 %v965_v1  ;;  %v971_v7 = vld [vmem:[%s1299_s3 + $0x8] sm:$0xff]   ;;  %v972_v8 = vld [vmem:[%s1299_s3] sm:$0xff]   ;;  %v973_v13 = vld [vmem:[%s1302_s6 + $0x38] sm:$0xff]  }
   0x4   :  { %861 = vmatprep.subr.bf16.mxu0 %v1023_v0  ;;  %881 = vmatprep.subr.bf16.mxu1 %v1023_v0  ;;  %v1131_v9 = vld [vmem:[%s1300_s0] sm:$0xff]  ;;  %v977_v15 = vld [vmem:[%s1302_s6 + $0x30] sm:$0xff]   ;;  %v979_v16 = vld [vmem:[%s1302_s6 + $0x28] sm:$0xff]   ;;  %v272_v42 = vsub.s32 0, %v271_v41  ;;  %v282_v46 = vsub.s32 1, %v271_v41 }
   0x5   :  { %v1136_v10 = vld [vmem:[%s1301_s1] sm:$0xff]  ;;  %v1142_v11 = vpack.c.bf16 %v1131_v9, %v1131_v9  ;;  %v983_v18 = vld [vmem:[%s1302_s6 + $0x18] sm:$0xff]   ;;  %v985_v19 = vld [vmem:[%s1302_s6 + $0x10] sm:$0xff]  }
   0x6   :  { %v145_v12 = vpack.c.bf16 %v1136_v10, %v1136_v10  ;;  %v974_v14 = vld [vmem:[%s1303_s2] sm:$0xff]   ;;  %v987_v20 = vld [vmem:[%s1302_s6 + $0x8] sm:$0xff]   ;;  %v976_v30 = vld [vmem:[%s1304_s5 + $0x38] sm:$0xff]  }
   0x7   :  { %862 = vmatpush3.bf16.msra.mxu0 %v966_v2  ;;  %882 = vmatpush3.bf16.msra.mxu1 %v966_v2  ;;  %v981_v17 = vld [vmem:[%s1302_s6 + $0x20] sm:$0xff]   ;;  %v975_v27 = vld [vmem:[%s1303_s2 + $0x8] sm:$0xff]   ;;  %v978_v33 = vld [vmem:[%s1304_s5 + $0x30] sm:$0xff]  }
   0x8   :  { %863 = vmatprep.subr.bf16.mxu0 %v1023_v0  ;;  %883 = vmatprep.subr.bf16.mxu1 %v1023_v0  ;;  %v989_v21 = vld [vmem:[%s1302_s6] sm:$0xff]   ;;  %v980_v34 = vld [vmem:[%s1304_s5 + $0x28] sm:$0xff]   ;;  %v984_v36 = vld [vmem:[%s1304_s5 + $0x18] sm:$0xff]  }
   0x9   :  { %v982_v35 = vld [vmem:[%s1304_s5 + $0x20] sm:$0xff]   ;;  %v986_v37 = vld [vmem:[%s1304_s5 + $0x10] sm:$0xff]   ;;  %v988_v38 = vld [vmem:[%s1304_s5 + $0x8] sm:$0xff]  }
   0xa   :  { %v990_v39 = vld [vmem:[%s1304_s5] sm:$0xff]  }
   0xb   :  { %864 = vmatpush3.bf16.msra.mxu0 %v967_v3  ;;  %884 = vmatpush3.bf16.msra.mxu1 %v967_v3  ;;  %v268_v43 = vld [vmem:[%s1305_s4] sm:$0x3] }
   0xc   :  { %865 = vmatprep.subr.bf16.mxu0 %v1023_v0  ;;  %885 = vmatprep.subr.bf16.mxu1 %v1023_v0  ;;  %v273_v44 = vrot.slane %v268_v43, %v272_v42  ;;  %v283_v48 = vrot.slane %v268_v43, %v282_v46  ;;  %v803_v49 = vld [vmem:[%s1306_s7 + $0x1] ss:$0 sm:$0xff] }
   0xe   :  { %v274_v45 = vmul.f32 %v273_v44, %v1131_v9  ;;  %v277_v47 = vmul.f32 %v273_v44, %v1136_v10  ;;  %v793_v9 = vld [vmem:[%s1306_s7] ss:$0 sm:$0xff] }
   0xf   :  { %866 = vmatpush3.bf16.msra.mxu0 %v968_v4  ;;  %886 = vmatpush3.bf16.msra.mxu1 %v968_v4 }
  0x10   :  { %867 = vmatprep.subr.bf16.mxu0 %v1023_v0  ;;  %887 = vmatprep.subr.bf16.mxu1 %v1023_v0 }
  0x11   :  { %275 = vadd.xlane.f32.xlu0 %v274_v45 }
  0x13   :  { %868 = vmatpush3.bf16.msra.mxu0 %v969_v5  ;;  %888 = vmatpush3.bf16.msra.mxu1 %v969_v5 }
  0x14   :  { %869 = vmatprep.subr.bf16.mxu0 %v1023_v0  ;;  %889 = vmatprep.subr.bf16.mxu1 %v1023_v0 }
  0x15   :  { %278 = vadd.xlane.f32.xlu0 %v277_v47 }
  0x17   :  { %870 = vmatpush3.bf16.msra.mxu0 %v970_v6  ;;  %890 = vmatpush3.bf16.msra.mxu1 %v970_v6 }
  0x18   :  { %871 = vmatprep.subr.bf16.mxu0 %v1023_v0  ;;  %891 = vmatprep.subr.bf16.mxu1 %v1023_v0 }
  0x1b   :  { %872 = vmatpush3.bf16.msra.mxu0 %v971_v7  ;;  %892 = vmatpush3.bf16.msra.mxu1 %v971_v7 }
  0x1c   :  { %873 = vmatprep.subr.bf16.mxu0 %v1023_v0  ;;  %893 = vmatprep.subr.bf16.mxu1 %v1023_v0 }
  0x1f   :  { %874 = vmatpush3.bf16.msra.mxu0 %v972_v8  ;;  %894 = vmatpush3.bf16.msra.mxu1 %v972_v8 }
  0x20   :  { %925 = vmatprep.subr.bf16.mxu0 %v1023_v0 }
  0x22   :  { %876 = vmatmul.mubr.bf16.vlgmr.msra.gmra.mxu0 %v1142_v11  ;;  %896 = vmatmul.mubr.bf16.vlgmr.msra.gmra.mxu1 %v145_v12 }
  0x23   :  { %941 = vmatprep.mubr.msk.bf16.mxu0 %vm1024_vm0, %v1023_v0  ;;  %926 = vmatpush3.bf16.msra.mxu0 %v973_v13 }
  0x24   :  { %901 = vmatprep.mubr.msk.bf16.mxu1 %vm204_vm1, %v974_v14  ;;  %927 = vmatprep.subr.bf16.mxu0 %v1023_v0 }
  0x27   :  { %928 = vmatpush3.bf16.msra.mxu0 %v977_v15 }
  0x28   :  { %929 = vmatprep.subr.bf16.mxu0 %v1023_v0 }
  0x2b   :  { %930 = vmatpush3.bf16.msra.mxu0 %v979_v16 }
  0x2c   :  { %931 = vmatprep.subr.bf16.mxu0 %v1023_v0 }
  0x2f   :  { %932 = vmatpush3.bf16.msra.mxu0 %v981_v17 }
  0x30   :  { %933 = vmatprep.subr.bf16.mxu0 %v1023_v0 }
  0x33   :  { %934 = vmatpush3.bf16.msra.mxu0 %v983_v18 }
  0x34   :  { %935 = vmatprep.subr.bf16.mxu0 %v1023_v0 }
  0x37   :  { %936 = vmatpush3.bf16.msra.mxu0 %v985_v19 }
  0x38   :  { %937 = vmatprep.subr.bf16.mxu0 %v1023_v0 }
  0x3b   :  { %938 = vmatpush3.bf16.msra.mxu0 %v987_v20 }
  0x3c   :  { %939 = vmatprep.subr.bf16.mxu0 %v1023_v0 }
  0x3f   :  { %940 = vmatpush3.bf16.msra.mxu0 %v989_v21 }
  0x40   :  { %950 = vmatprep.subr.bf16.mxu0 %v1023_v0 }
  0x42   :  { %942 = vmatmul.mubr.bf16.vlgmr.msra.gmra.mxu0 %v145_v12 }
  0x43   :  { %952 = vmatprep.mubr.msk.bf16.mxu0 %vm1024_vm0, %v1023_v0 }
  0x9a   :  { %v276_v19 = vpop.xlane.xlu0 %275 }
  0x9e   :  { %v279_v20 = vpop.xlane.xlu0 %278 }
  0xe2   :  { %v138_v22 = vpop.f32.mrf.mxu0  ;;  %v180_v23 = vpop.f32.mrf.mxu1 }
  0xe3   :  { %v193_v24 = vpack.c.bf16 %v180_v23, %v138_v22 }
  0xe4   :  { %v877_v25 = vpop.f32.mrf.mxu0  ;;  %v897_v26 = vpop.f32.mrf.mxu1 }
  0xe5   :  { %899 = vmatprep.subr.bf16.mxu1 %v193_v24 }
  0xe6   :  { %v141_v28 = vpop.f32.mrf.mxu0  ;;  %v183_v29 = vpop.f32.mrf.mxu1  ;;  %900 = vmatpush3.bf16.msra.mxu1 %v193_v24  ;;  %v292_v24 = vstv %s1308_s8 }
  0xe7   :  { %905 = vmatprep.subr.bf16.mxu1 %v1023_v0 }
  0xe8   :  { %v878_v31 = vpop.f32.mrf.mxu0  ;;  %v898_v32 = vpop.f32.mrf.mxu1 }
  0xe9   :  { %902 = vmatmul.mubr.msk.bf16.vlgmr.msra.gmra.mxu1 %vm204_vm1, %v975_v27 }
  0xea   :  { %906 = vmatpush3.bf16.msra.mxu1 %v976_v30  ;;  %921 = vmatprep.mubr.msk.bf16.mxu1 %vm1024_vm0, %v1023_v0 }
  0xeb   :  { %907 = vmatprep.subr.bf16.mxu1 %v1023_v0 }
  0xee   :  { %908 = vmatpush3.bf16.msra.mxu1 %v978_v33 }
  0xef   :  { %909 = vmatprep.subr.bf16.mxu1 %v1023_v0 }
  0xf2   :  { %910 = vmatpush3.bf16.msra.mxu1 %v980_v34 }
  0xf3   :  { %911 = vmatprep.subr.bf16.mxu1 %v1023_v0 }
  0xf6   :  { %912 = vmatpush3.bf16.msra.mxu1 %v982_v35 }
  0xf7   :  { %913 = vmatprep.subr.bf16.mxu1 %v1023_v0 }
  0xfa   :  { %914 = vmatpush3.bf16.msra.mxu1 %v984_v36 }
  0xfb   :  { %915 = vmatprep.subr.bf16.mxu1 %v1023_v0 }
  0xfe   :  { %916 = vmatpush3.bf16.msra.mxu1 %v986_v37 }
  0xff   :  { %917 = vmatprep.subr.bf16.mxu1 %v1023_v0 }
 0x102   :  { %918 = vmatpush3.bf16.msra.mxu1 %v988_v38  ;;  %v630_v50 = vpop.f32.mrf.mxu0 }
 0x103   :  { %919 = vmatprep.subr.bf16.mxu1 %v1023_v0  ;;  %v631_v51 = vadd.f32 %v803_v49, %v630_v50 }
 0x104   :  { %v943_v52 = vpop.f32.mrf.mxu0 }
 0x105   :  { %v812_v53 = vmul.f32 -1.442695, %v631_v51  ;;  %v1025_v52 = vmov 0  }
 0x106   :  { %920 = vmatpush3.bf16.msra.mxu1 %v990_v39  ;;  %v633_v54 = vpop.f32.mrf.mxu0  ;;  %964 = vset.pattern.permute.xlu1 %v1025_v52 }
 0x107   :  { %945 = vmatprep.subr.mxu1 %v1023_v0  ;;  %991 = vpow2.f32 %v812_v53  ;;  %963 = vset.pattern.permute.xlu0 %v1025_v52 }
 0x108   :  { %v944_v55 = vpop.f32.mrf.mxu0 }
 0x109   :  { %922 = vmatmul.mubr.bf16.vlgmr.msra.gmra.mxu1 %v1142_v11 }
 0x10a   :  { %947 = vmatprep.mubr.msk.f32.mxu1 %vm1024_vm0, %v1023_v0 }
 0x114   :  { %v992_v56 = vpop.eup %991 }
 0x115   :  { %v639_v57 = vadd.f32 1.0, %v992_v56 }
 0x117   :  { %993 = vrcp.f32 %v639_v57 }
 0x124   :  { %v994_v58 = vpop.eup %993 }
 0x125   :  { %946 = vmatpush3.xpose.msk.msra.mxu1 %vm644_vm2, %v994_v58 }
 0x1a9   :  { %v903_v59 = vpop.f32.mrf.mxu1 }
 0x1aa   :  { %v1239_v60 = vmax.f32 %v903_v59, 0.0 }
 0x1ab   :  { %v245_v61 = vpop.f32.mrf.mxu1 }
 0x1ac   :  { %266 = vst [vmem:[%s1307_s9 + $0x10] sm:$0xff] %v1239_v60  ;;  %v1245_v62 = vmax.f32 %v245_v61, 0.0  ;;  %v349_v63 = vmul.f32 %v283_v48, %v1239_v60 }
 0x1ad   :  { %v904_v0 = vpop.f32.mrf.mxu1 }
 0x1ae   :  { %264 = vst [vmem:[%s1307_s9] sm:$0xff] %v1245_v62  ;;  %v1252_v1 = vmax.f32 %v904_v0, 0.0  ;;  %v284_v2 = vmul.f32 %v283_v48, %v1245_v62  ;;  %351 = vadd.xlane.f32.xlu0 %v349_v63  ;;  %v642_v8 = vpack.c.bf16 %v1245_v62, %v1245_v62 }
 0x1af   :  { %v248_v3 = vpop.f32.mrf.mxu1 }
 0x1b0   :  { %267 = vst [vmem:[%s1307_s9 + $0x18] sm:$0xff] %v1252_v1  ;;  %v1259_v4 = vmax.f32 %v248_v3, 0.0  ;;  %286 = vadd.xlane.f32.xlu1 %v284_v2  ;;  %v350_v7 = vmul.f32 %v283_v48, %v1252_v1 }
 0x1b2   :  { %265 = vst [vmem:[%s1307_s9 + $0x8] sm:$0xff] %v1259_v4  ;;  %v643_v5 = vpack.c.bf16 %v1259_v4, %v1259_v4  ;;  %v285_v6 = vmul.f32 %v283_v48, %v1259_v4 }
 0x1b4   :  { %951 = vmatpush3.bf16.xpose.msra.mxu0 %v643_v5  ;;  %288 = vadd.xlane.f32.xlu1 %v285_v6 }
 0x1b8   :  { %353 = vadd.xlane.f32.xlu1 %v350_v7 }
 0x1bb   :  { %953 = vmatmul.mubr.bf16.vlgmr.msra.gmra.mxu0 %v642_v8 }
 0x1c9   :  { %v515_v10 = vpop.f32.mrf.mxu1 }
 0x1ca   :  { %v516_v11 = vadd.f32 %v793_v9, %v515_v10 }
 0x1cb   :  { %v923_v12 = vpop.f32.mrf.mxu1 }
 0x1cc   :  { %v802_v13 = vmul.f32 -1.442695, %v516_v11 }
 0x1cd   :  { %v518_v14 = vpop.f32.mrf.mxu1 }
 0x1ce   :  { %995 = vpow2.f32 %v802_v13 }
 0x1cf   :  { %v924_v15 = vpop.f32.mrf.mxu1 }
 0x1db   :  { %v996_v16 = vpop.eup %995 }
 0x1dc   :  { %v524_v17 = vadd.f32 1.0, %v996_v16 }
 0x1de   :  { %997 = vrcp.f32 %v524_v17 }
 0x1eb   :  { %v998_v18 = vpop.eup %997 }
 0x1ec   :  { %948 = vmatmul.mubr.msk.f32.vlgmr.msra.gmra.mxu1 %vm644_vm2, %v998_v18 }
 0x237   :  { %v352_v22 = vpop.xlane.xlu0 %351 }
 0x238   :  { %v355_v26 = vadd.f32 %v352_v22, %v276_v19 }
 0x239   :  { %v287_v21 = vpop.xlane.xlu1 %286 }
 0x23a   :  { %v290_v23 = vadd.f32 %v287_v21, %v276_v19  ;;  %v357_v29 = vadd.f32 %v355_v26, %v292_v24 }
 0x23c   :  { %v293_v25 = vadd.f32 %v292_v24, %v290_v23 }
 0x23d   :  { %v289_v27 = vpop.xlane.xlu1 %288 }
 0x23e   :  { %v291_v28 = vadd.f32 %v289_v27, %v279_v20  ;;  %999 = vtanh.f32 %v293_v25 }
 0x240   :  { %v294_v30 = vadd.f32 %v292_v24, %v291_v28 }
 0x241   :  { %v354_v31 = vpop.xlane.xlu1 %353 }
 0x242   :  { %1001 = vtanh.f32 %v294_v30  ;;  %v356_v32 = vadd.f32 %v354_v31, %v279_v20 }
 0x243   :  { %1003 = vtanh.f32 %v357_v29 }
 0x244   :  { %v358_v33 = vadd.f32 %v356_v32, %v292_v24 }
 0x246   :  { %1005 = vtanh.f32 %v358_v33 }
 0x24b   :  { %v1000_v34 = vpop.eup %999 }
 0x24c   :  { %v298_v36 = vsel %vm297_vm3, %v1000_v34, -inf }
 0x24f   :  { %v1002_v35 = vpop.eup %1001 }
 0x250   :  { %v299_v37 = vsel %vm297_vm3, %v1002_v35, -inf  ;;  %v1004_v38 = vpop.eup %1003 }
 0x251   :  { %v300_v39 = vmax.f32 %v298_v36, %v299_v37  ;;  %v361_v41 = vsel %vm297_vm3, %v1004_v38, -inf }
 0x253   :  { %v1006_v40 = vpop.eup %1005  ;;  %301 = vmax.xlane.f32.xlu0 %v300_v39 }
 0x254   :  { %v362_v42 = vsel %vm297_vm3, %v1006_v40, -inf }
 0x255   :  { %v363_v43 = vmax.f32 %v361_v41, %v362_v42 }
 0x257   :  { %364 = vmax.xlane.f32.xlu1 %v363_v43 }
 0x27b   :  { %v755_v44 = vpop.f32.mrf.mxu0 }
 0x27d   :  { %v954_v45 = vpop.f32.mrf.mxu0 }
 0x27f   :  { %v758_v46 = vpop.f32.mrf.mxu0 }
 0x281   :  { %v955_v47 = vpop.f32.mrf.mxu0 }
 0x2ac   :  { %v717_v48 = vpop.f32.mrf.mxu1 }
 0x2ad   :  { %v756_v49 = vadd.f32 %v755_v44, %v717_v48 }
 0x2ae   :  { %v949_v50 = vpop.f32.mrf.mxu1 }
 0x2af   :  { %v815_v51 = vmul.f32 -1.442695, %v756_v49 }
 0x2b1   :  { %1007 = vpow2.f32 %v815_v51 }
 0x2be   :  { %v1008_v53 = vpop.eup %1007 }
 0x2bf   :  { %v764_v54 = vadd.f32 1.0, %v1008_v53 }
 0x2c1   :  { %1009 = vrcp.f32 %v764_v54 }
 0x2ce   :  { %v1010_v55 = vpop.eup %1009 }
 0x2cf   :  { %768 = vst.msk [vmem:[%s1309_s11] sm:$0xff] %vm767_vm4, %v1010_v55 }
 0x2dc   :  { %v302_v56 = vpop.xlane.xlu0 %301 }
 0x2dd   :  { %v303_v57 = vrot.slane %v302_v56, 4 }
 0x2df   :  { %v304_v58 = vmax.f32 %v302_v56, %v303_v57 }
 0x2e0   :  { %v365_v59 = vpop.xlane.xlu1 %364 }
 0x2e1   :  { %v305_v61 = vrot.slane %v304_v58, 2  ;;  %v366_v63 = vrot.slane %v365_v59, 4 }
 0x2e3   :  { %v367_v0 = vmax.f32 %v365_v59, %v366_v63  ;;  %v306_v2 = vmax.f32 %v304_v58, %v305_v61 }
 0x2e5   :  { %v368_v3 = vrot.slane %v367_v0, 2  ;;  %v307_v5 = vrot.slane %v306_v2, 1 }
 0x2e7   :  { %v308_v6 = vmax.f32 %v306_v2, %v307_v5  ;;  %v369_v7 = vmax.f32 %v367_v0, %v368_v3 }
 0x2e9   :  { %956 = vpush %v308_v6  ;;  %v370_v8 = vrot.slane %v369_v7, 1 }
 0x2eb   :  { %v371_v9 = vmax.f32 %v369_v7, %v370_v8 }
 0x2ed   :  { %958 = vpush %v371_v9 }
 0x31a   :  { %s957_s1 = spop %956 }
 0x31b   :  { %v310_v10 = vstv %s957_s1 }
 0x31c   :  { %v311_v11 = vsub.f32 %v1000_v34, %v310_v10  ;;  %v312_v12 = vsub.f32 %v1002_v35, %v310_v10 }
 0x31e   :  { %v313_v13 = vmul.f32 1.442695, %v311_v11  ;;  %v315_v14 = vmul.f32 1.442695, %v312_v12  ;;  %s959_s11 = spop %958 }
 0x31f   :  { %v373_v15 = vstv %s959_s11 }
 0x320   :  { %1011 = vpow2.f32 %v313_v13  ;;  %v374_v16 = vsub.f32 %v1004_v38, %v373_v15  ;;  %v375_v17 = vsub.f32 %v1006_v40, %v373_v15 }
 0x321   :  { %1013 = vpow2.f32 %v315_v14 }
 0x322   :  { %v376_v18 = vmul.f32 1.442695, %v374_v16  ;;  %v378_v19 = vmul.f32 1.442695, %v375_v17 }
 0x324   :  { %1015 = vpow2.f32 %v376_v18 }
 0x325   :  { %1017 = vpow2.f32 %v378_v19 }
 0x32d   :  { %v1012_v20 = vpop.eup %1011 }
 0x32e   :  { %v1014_v21 = vpop.eup %1013  ;;  %v317_v22 = vsel %vm297_vm3, %v1012_v20, 0.0 }
 0x32f   :  { %v318_v23 = vsel %vm297_vm3, %v1014_v21, 0.0 }
 0x330   :  { %v319_v24 = vadd.f32 %v318_v23, %v317_v22 }
 0x331   :  { %v1016_v25 = vpop.eup %1015 }
 0x332   :  { %v1018_v26 = vpop.eup %1017  ;;  %v320_v27 = vrot.slane %v319_v24, 4  ;;  %v380_v28 = vsel %vm297_vm3, %v1016_v25, 0.0 }
 0x333   :  { %v381_v29 = vsel %vm297_vm3, %v1018_v26, 0.0 }
 0x334   :  { %v321_v30 = vadd.f32 %v320_v27, %v319_v24  ;;  %v382_v31 = vadd.f32 %v381_v29, %v380_v28 }
 0x336   :  { %v322_v32 = vrot.slane %v321_v30, 2  ;;  %v383_v33 = vrot.slane %v382_v31, 4 }
 0x338   :  { %v384_v34 = vadd.f32 %v383_v33, %v382_v31  ;;  %v323_v35 = vadd.f32 %v322_v32, %v321_v30 }
 0x33a   :  { %v385_v36 = vrot.slane %v384_v34, 2  ;;  %v324_v37 = vrot.slane %v323_v35, 1 }
 0x33c   :  { %v325_v38 = vadd.f32 %v324_v37, %v323_v35  ;;  %v386_v39 = vadd.f32 %v385_v36, %v384_v34 }
 0x33e   :  { %1019 = vrcp.f32 %v325_v38  ;;  %v387_v40 = vrot.slane %v386_v39, 1 }
 0x340   :  { %v388_v41 = vadd.f32 %v387_v40, %v386_v39 }
 0x342   :  { %1021 = vrcp.f32 %v388_v41 }
 0x34b   :  { %v1020_v42 = vpop.eup %1019 }
 0x34c   :  { %v327_v43 = vmul.f32 %v1020_v42, %v1012_v20  ;;  %v328_v44 = vmul.f32 %v1020_v42, %v1014_v21 }
 0x34e   :  { %331 = vperm.xlu0 %963, %v327_v43   ;;  %336 = vperm.xlu1 %964, %v328_v44  }
 0x34f   :  { %v1022_v45 = vpop.eup %1021 }
 0x350   :  { %v390_v46 = vmul.f32 %v1022_v45, %v1016_v25  ;;  %v391_v47 = vmul.f32 %v1022_v45, %v1018_v26 }
 0x352   :  { %394 = vperm.xlu1 %964, %v390_v46  }
 0x356   :  { %399 = vperm.xlu1 %964, %v391_v47  }
 0x3c9   :  { %v332_v48 = vpop.permute.xlu0 %331  ;;  %v337_v49 = vpop.permute.xlu1 %336 }
 0x3ca   :  { %v339_v50 = vmul.f32 %v332_v48, %v1245_v62  ;;  %v340_v51 = vmul.f32 %v337_v49, %v1259_v4 }
 0x3cc   :  { %v341_v52 = vadd.f32 %v340_v51, %v339_v50 }
 0x3cd   :  { %v395_v53 = vpop.permute.xlu1 %394 }
 0x3ce   :  { %v342_v54 = vrot.slane %v341_v52, 4  ;;  %v402_v58 = vmul.f32 %v395_v53, %v1239_v60 }
 0x3d0   :  { %v343_v55 = vadd.f32 %v342_v54, %v341_v52 }
 0x3d1   :  { %v400_v56 = vpop.permute.xlu1 %399 }
 0x3d2   :  { %v344_v57 = vrot.slane %v343_v55, 2  ;;  %v403_v59 = vmul.f32 %v400_v56, %v1252_v1 }
 0x3d4   :  { %v345_v61 = vadd.f32 %v344_v57, %v343_v55  ;;  %v404_v63 = vadd.f32 %v403_v59, %v402_v58 }
 0x3d6   :  { %v346_v0 = vrot.slane %v345_v61, 1  ;;  %v405_v2 = vrot.slane %v404_v63, 4 }
 0x3d8   :  { %v347_v3 = vadd.f32 %v346_v0, %v345_v61  ;;  %v406_v5 = vadd.f32 %v405_v2, %v404_v63 }
 0x3da   :  { %348 = vst [vmem:[%s1310_s10] sm:$0x1] %v347_v3  ;;  %v407_v62 = vrot.slane %v406_v5, 2 }
 0x3dc   :  { %v408_v4 = vadd.f32 %v407_v62, %v406_v5 }
 0x3de   :  { %v409_v6 = vrot.slane %v408_v4, 1 }
 0x3e0   :  { %v410_v7 = vadd.f32 %v409_v6, %v408_v4 }
 0x3e2   :  { %411 = vst [vmem:[%s1310_s10 + $0x1] sm:$0x1] %v410_v7 }

</bundles_post_ra>
